<compile_context>
chip_gen: v7x
topology: tpu7x:2x2x1
jax: 0.10.0
libtpu: 0.0.40
codegen_flags: <defaults>
</compile_context>

<pallas_src>
import functools

import jax
import jax.numpy as jnp
from jax.experimental import pallas as pl
from jax.experimental.pallas import tpu as pltpu

# Keep the pure-JAX reference matmuls/einsums at f32 precision so they match the
# in-kernel f32 MXU matmuls (the TPU default would otherwise demote to bf16 passes).
jax.config.update("jax_default_matmul_precision", "highest")


# ------------------------------ fused kernel ---------------------------------

def _make_stgcn_kernel(B, N):
    """Kernel closure over static batch / node counts (used for the block-diag loop)."""

    def kernel(x_ref, a_ref, w1t_ref, b1t_ref, w1g_ref, b1g_ref, th_ref,
               w2t_ref, b2t_ref, w2g_ref, b2g_ref, o_ref):
        # x_ref : (B*N, T*C_in)            a_ref : (N, N)
        # w1t/w1g: (T*C_in, T1*C1)         b1t/b1g: (1, T1*C1)
        # th_ref : (T1*C1, T1*S)
        # w2t/w2g: (T1*S, T2*C2)           b2t/b2g: (1, T2*C2)
        # o_ref  : (B*N, T2*C2)
        x = x_ref[...]

        # --- temporal1: pre-summed (conv1+conv2) branch + gate branch, no lane slicing
        temp1 = jnp.dot(x, w1t_ref[...],
                        preferred_element_type=jnp.float32) + b1t_ref[...]
        gate1 = jax.nn.sigmoid(
            jnp.dot(x, w1g_ref[...], preferred_element_type=jnp.float32) + b1g_ref[...])
        t1 = jnp.tanh(gate1 * temp1)                                    # (B*N, T1*C1)

        # --- spatial: (A @ X) @ Theta == A @ (X @ kron(I_T1, Theta)) ---
        proj = jnp.dot(t1, th_ref[...],
                       preferred_element_type=jnp.float32)              # (B*N, T1*S)
        a = a_ref[...]
        rows = [jnp.dot(a, proj[b * N:(b + 1) * N, :],                  # sublane-aligned
                        preferred_element_type=jnp.float32)
                for b in range(B)]
        t2 = jnp.tanh(jnp.concatenate(rows, axis=0) if B > 1 else rows[0])

        # --- temporal2: same two-branch structure; output lanes = T2*C2 (= 128) ---
        temp2 = jnp.dot(t2, w2t_ref[...],
                        preferred_element_type=jnp.float32) + b2t_ref[...]
        gate2 = jax.nn.sigmoid(
            jnp.dot(t2, w2g_ref[...], preferred_element_type=jnp.float32) + b2g_ref[...])
        o_ref[...] = jnp.tanh(gate2 * temp2).astype(o_ref.dtype)

    return kernel


# -------------------------- one-time weight packing ---------------------------

def _banded_temporal_weight(w, T):
    """w: (K, C_in, C_out) -> banded block matrix (T*C_in, T_out*C_out).

    Column block t_out, row block t_in holds w[t_in - t_out] when 0 <= t_in-t_out < K,
    so (N, T*C_in) @ result computes the (1, K) temporal conv for every node row.
    """
    K, C_in, C_out = w.shape
    T_out = T - K + 1
    zero = jnp.zeros((C_in, C_out), w.dtype)
    cols = []
    for t_out in range(T_out):
        rows = [zero] * T
        for k in range(K):
            rows[t_out + k] = w[k]
        cols.append(jnp.concatenate(rows, axis=0))        # (T*C_in, C_out)
    return jnp.concatenate(cols, axis=1)                  # (T*C_in, T_out*C_out)


def pack_stgcn_params(params, T):
    """Pack STGCNBlock params into fused-kernel layouts.  Call ONCE at init."""
    w11, w12, w13, b11, b12, b13 = params["temporal1"]
    theta1 = params["theta1"]
    w21, w22, w23, b21, b22, b23 = params["temporal2"]

    K = w11.shape[0]
    T1 = T - K + 1
    T2 = T1 - K + 1

    # temporal1: temp branch pre-summed (w1+w2), gate branch (w3)
    W1t = _banded_temporal_weight(w11 + w12, T)           # (T*C_in, T1*C1)
    B1t = jnp.tile(b11 + b12, (1, T1))                    # (1, T1*C1)
    W1g = _banded_temporal_weight(w13, T)
    B1g = jnp.tile(b13, (1, T1))

    # spatial: Theta1 as block-diagonal over output time steps
    theta_blk = jnp.kron(jnp.eye(T1, dtype=theta1.dtype), theta1)   # (T1*C1, T1*S)

    # temporal2
    W2t = _banded_temporal_weight(w21 + w22, T1)          # (T1*S, T2*C2)
    B2t = jnp.tile(b21 + b22, (1, T2))
    W2g = _banded_temporal_weight(w23, T1)
    B2g = jnp.tile(b23, (1, T2))

    return {
        "W1t": W1t, "B1t": B1t, "W1g": W1g, "B1g": B1g,
        "theta_blk": theta_blk,
        "W2t": W2t, "B2t": B2t, "W2g": W2g, "B2g": B2g,
    }


# ------------------------------ STGCNBlock forward ------------------------------

def stgcn_block_forward(x, a_hat, packed, *, kernel_size, out_channels):
    """x: (B, N, T, C_in), a_hat: (N, N) -> (B, N, T-2*(K-1), out_channels)."""
    B, N, T, C_in = x.shape
    K = kernel_size
    T1 = T - K + 1
    T2 = T1 - K + 1
    C2 = out_channels
    M = B * N

    x_flat = x.reshape(M, T * C_in)

    W1t, B1t = packed["W1t"], packed["B1t"]
    W1g, B1g = packed["W1g"], packed["B1g"]
    Thb = packed["theta_blk"]
    W2t, B2t = packed["W2t"], packed["B2t"]
    W2g, B2g = packed["W2g"], packed["B2g"]

    def _full2d(shape):
        return pl.BlockSpec(shape, lambda i: (0, 0))

    out_flat = pl.pallas_call(
        _make_stgcn_kernel(B, N),
        out_shape=jax.ShapeDtypeStruct((M, T2 * C2), jnp.float32),
        grid=(1,),
        in_specs=[
            _full2d((M, T * C_in)),
            _full2d((N, N)),
            _full2d(W1t.shape), _full2d(B1t.shape),
            _full2d(W1g.shape), _full2d(B1g.shape),
            _full2d(Thb.shape),
            _full2d(W2t.shape), _full2d(B2t.shape),
            _full2d(W2g.shape), _full2d(B2g.shape),
        ],
        out_specs=_full2d((M, T2 * C2)),
        compiler_params=pltpu.CompilerParams(dimension_semantics=("arbitrary",)),
    )(x_flat, a_hat, W1t, B1t, W1g, B1g, Thb, W2t, B2t, W2g, B2g)

    return out_flat.reshape(B, N, T2, C2)


# --------------------------- pure-JAX reference --------------------------------

def _time_block_ref(x, w1, w2, w3, b1, b2, b3):
    K = w1.shape[0]
    T_out = x.shape[2] - K + 1

    def conv(w, b):
        acc = jnp.zeros(x.shape[:2] + (T_out, w.shape[2]), jnp.float32)
        for k in range(K):
            acc = acc + jnp.einsum('bntc,co->bnto', x[:, :, k:k + T_out, :], w[k])
        return acc + b

    temp = conv(w1, b1) + conv(w2, b2)
    gate = jax.nn.sigmoid(conv(w3, b3))
    return jnp.tanh(gate * temp)


def _stgcn_ref(x, a_hat, params):
    t = _time_block_ref(x, *params["temporal1"])
    lfs = jnp.einsum('ij,bjtc->bitc', a_hat, t)
    t2 = jnp.tanh(jnp.einsum('bitc,cs->bits', lfs, params["theta1"]))
    return _time_block_ref(t2, *params["temporal2"])


# ----------------------------------- main ---------------------------------------

if __name__ == "__main__":
    B, N, T = 2, 8, 12
    in_channels, spatial_channels, out_channels = 4, 8, 16
    K = 3

    key = jax.random.PRNGKey(0)
    keys = jax.random.split(key, 20)

    x = jax.random.normal(keys[0], (B, N, T, in_channels), dtype=jnp.float32)

    # normalized adjacency matrix
    a = jax.random.uniform(keys[1], (N, N), dtype=jnp.float32)
    a = a + a.T + jnp.eye(N, dtype=jnp.float32)
    a_hat = a / a.sum(axis=1, keepdims=True)

    def conv_params(k_w, k_b, cin, cout):
        bound = 1.0 / (cin * K) ** 0.5
        w = jax.random.uniform(k_w, (K, cin, cout), jnp.float32, -bound, bound)
        b = jax.random.uniform(k_b, (1, cout), jnp.float32, -bound, bound)
        return w, b

    # temporal1: TimeBlock(in_channels -> out_channels)
    w11, b11 = conv_params(keys[2], keys[3], in_channels, out_channels)
    w12, b12 = conv_params(keys[4], keys[5], in_channels, out_channels)
    w13, b13 = conv_params(keys[6], keys[7], in_channels, out_channels)

    # Theta1: (out_channels, spatial_channels), uniform(-stdv, stdv)
    stdv = 1.0 / spatial_channels ** 0.5
    theta1 = jax.random.uniform(keys[8], (out_channels, spatial_channels),
                                jnp.float32, -stdv, stdv)

    # temporal2: TimeBlock(spatial_channels -> out_channels)
    w21, b21 = conv_params(keys[9], keys[10], spatial_channels, out_channels)
    w22, b22 = conv_params(keys[11], keys[12], spatial_channels, out_channels)
    w23, b23 = conv_params(keys[13], keys[14], spatial_channels, out_channels)

    params = {
        "temporal1": (w11, w12, w13, b11, b12, b13),
        "theta1": theta1,
        "temporal2": (w21, w22, w23, b21, b22, b23),
    }

    # Pack weights ONCE (hoisted out of the per-call forward path).
    packed = jax.tree_util.tree_map(jnp.asarray, pack_stgcn_params(params, T))

    fwd = jax.jit(functools.partial(stgcn_block_forward,
                                    kernel_size=K, out_channels=out_channels))
    out = jax.block_until_ready(fwd(x, a_hat, packed))
    ref = _stgcn_ref(x, a_hat, params)

    assert out.shape == (B, N, T - 2 * (K - 1), out_channels), out.shape
    assert jnp.allclose(out, ref, rtol=1e-5, atol=5e-5), \
        f"max abs err = {jnp.max(jnp.abs(out - ref))}"

    print("KERNEL_OK")
</pallas_src>

<mosaic_0001>
module attributes {stable_mosaic.version = 11 : i64} {
  func.func @kernel(%arg0: i32, %arg1: memref<16x48xf32, #tpu.memory_space<vmem>>, %arg2: memref<8x8xf32, #tpu.memory_space<vmem>>, %arg3: memref<48x160xf32, #tpu.memory_space<vmem>>, %arg4: memref<1x160xf32, #tpu.memory_space<vmem>>, %arg5: memref<48x160xf32, #tpu.memory_space<vmem>>, %arg6: memref<1x160xf32, #tpu.memory_space<vmem>>, %arg7: memref<160x80xf32, #tpu.memory_space<vmem>>, %arg8: memref<80x128xf32, #tpu.memory_space<vmem>>, %arg9: memref<1x128xf32, #tpu.memory_space<vmem>>, %arg10: memref<80x128xf32, #tpu.memory_space<vmem>>, %arg11: memref<1x128xf32, #tpu.memory_space<vmem>>, %arg12: memref<16x128xf32, #tpu.memory_space<vmem>>) attributes {dimension_semantics = [#tpu.dimension_semantics<arbitrary>], iteration_bounds = array<i64: 1>, scalar_prefetch = 0 : i64, scratch_operands = 0 : i64, tpu.core_type = #tpu.core_type<tc>, window_params = [{pipeline_mode = #tpu.pipeline_mode<synchronous>, transform_indices = @transform_0, window_bounds = array<i64: 16, 48>}, {pipeline_mode = #tpu.pipeline_mode<synchronous>, transform_indices = @transform_1, window_bounds = array<i64: 8, 8>}, {pipeline_mode = #tpu.pipeline_mode<synchronous>, transform_indices = @transform_2, window_bounds = array<i64: 48, 160>}, {pipeline_mode = #tpu.pipeline_mode<synchronous>, transform_indices = @transform_3, window_bounds = array<i64: 1, 160>}, {pipeline_mode = #tpu.pipeline_mode<synchronous>, transform_indices = @transform_4, window_bounds = array<i64: 48, 160>}, {pipeline_mode = #tpu.pipeline_mode<synchronous>, transform_indices = @transform_5, window_bounds = array<i64: 1, 160>}, {pipeline_mode = #tpu.pipeline_mode<synchronous>, transform_indices = @transform_6, window_bounds = array<i64: 160, 80>}, {pipeline_mode = #tpu.pipeline_mode<synchronous>, transform_indices = @transform_7, window_bounds = array<i64: 80, 128>}, {pipeline_mode = #tpu.pipeline_mode<synchronous>, transform_indices = @transform_8, window_bounds = array<i64: 1, 128>}, {pipeline_mode = #tpu.pipeline_mode<synchronous>, transform_indices = @transform_9, window_bounds = array<i64: 80, 128>}, {pipeline_mode = #tpu.pipeline_mode<synchronous>, transform_indices = @transform_10, window_bounds = array<i64: 1, 128>}, {pipeline_mode = #tpu.pipeline_mode<synchronous>, transform_indices = @transform_11, window_bounds = array<i64: 16, 128>}]} {
    %c0 = arith.constant 0 : index
    %c0_0 = arith.constant 0 : index
    %0 = vector.load %arg1[%c0, %c0_0] : memref<16x48xf32, #tpu.memory_space<vmem>>, vector<16x48xf32>
    %c0_1 = arith.constant 0 : index
    %c0_2 = arith.constant 0 : index
    %1 = vector.load %arg3[%c0_1, %c0_2] : memref<48x160xf32, #tpu.memory_space<vmem>>, vector<48x160xf32>
    %cst = arith.constant dense<0.000000e+00> : vector<16x160xf32>
    %2 = tpu.matmul %0, %1, %cst {dimension_numbers = #tpu.dot_dimension_numbers<[1], [0], [0], [1], [0, 0, 1, 1], [], []>, precision = #tpu.contract_precision<fp32>} : vector<16x48xf32>, vector<48x160xf32>, vector<16x160xf32> -> vector<16x160xf32>
    %c0_3 = arith.constant 0 : index
    %c0_4 = arith.constant 0 : index
    %3 = vector.load %arg4[%c0_3, %c0_4] : memref<1x160xf32, #tpu.memory_space<vmem>>, vector<1x160xf32>
    %4 = vector.broadcast %3 : vector<1x160xf32> to vector<16x160xf32>
    %5 = arith.addf %2, %4 : vector<16x160xf32>
    %c0_5 = arith.constant 0 : index
    %c0_6 = arith.constant 0 : index
    %6 = vector.load %arg5[%c0_5, %c0_6] : memref<48x160xf32, #tpu.memory_space<vmem>>, vector<48x160xf32>
    %cst_7 = arith.constant dense<0.000000e+00> : vector<16x160xf32>
    %7 = tpu.matmul %0, %6, %cst_7 {dimension_numbers = #tpu.dot_dimension_numbers<[1], [0], [0], [1], [0, 0, 1, 1], [], []>, precision = #tpu.contract_precision<fp32>} : vector<16x48xf32>, vector<48x160xf32>, vector<16x160xf32> -> vector<16x160xf32>
    %c0_8 = arith.constant 0 : index
    %c0_9 = arith.constant 0 : index
    %8 = vector.load %arg6[%c0_8, %c0_9] : memref<1x160xf32, #tpu.memory_space<vmem>>, vector<1x160xf32>
    %9 = vector.broadcast %8 : vector<1x160xf32> to vector<16x160xf32>
    %10 = arith.addf %7, %9 : vector<16x160xf32>
    %11 = arith.negf %10 : vector<16x160xf32>
    %12 = math.exp %11 : vector<16x160xf32>
    %cst_10 = arith.constant 1.000000e+00 : f32
    %13 = vector.broadcast %cst_10 : f32 to vector<16x160xf32>
    %14 = arith.addf %13, %12 : vector<16x160xf32>
    %15 = arith.divf %13, %14 : vector<16x160xf32>
    %16 = arith.mulf %15, %5 : vector<16x160xf32>
    %17 = math.tanh %16 : vector<16x160xf32>
    %c0_11 = arith.constant 0 : index
    %c0_12 = arith.constant 0 : index
    %18 = vector.load %arg7[%c0_11, %c0_12] : memref<160x80xf32, #tpu.memory_space<vmem>>, vector<160x80xf32>
    %cst_13 = arith.constant dense<0.000000e+00> : vector<16x80xf32>
    %19 = tpu.matmul %17, %18, %cst_13 {dimension_numbers = #tpu.dot_dimension_numbers<[1], [0], [0], [1], [0, 0, 1, 1], [], []>, precision = #tpu.contract_precision<fp32>} : vector<16x160xf32>, vector<160x80xf32>, vector<16x80xf32> -> vector<16x80xf32>
    %c0_14 = arith.constant 0 : index
    %c0_15 = arith.constant 0 : index
    %20 = vector.load %arg2[%c0_14, %c0_15] : memref<8x8xf32, #tpu.memory_space<vmem>>, vector<8x8xf32>
    %21 = vector.extract_strided_slice %19 {offsets = [0, 0], sizes = [8, 80], strides = [1, 1]} : vector<16x80xf32> to vector<8x80xf32>
    %cst_16 = arith.constant dense<0.000000e+00> : vector<8x80xf32>
    %22 = tpu.matmul %20, %21, %cst_16 {dimension_numbers = #tpu.dot_dimension_numbers<[1], [0], [0], [1], [0, 0, 1, 1], [], []>, precision = #tpu.contract_precision<fp32>} : vector<8x8xf32>, vector<8x80xf32>, vector<8x80xf32> -> vector<8x80xf32>
    %23 = vector.extract_strided_slice %19 {offsets = [8, 0], sizes = [8, 80], strides = [1, 1]} : vector<16x80xf32> to vector<8x80xf32>
    %cst_17 = arith.constant dense<0.000000e+00> : vector<8x80xf32>
    %24 = tpu.matmul %20, %23, %cst_17 {dimension_numbers = #tpu.dot_dimension_numbers<[1], [0], [0], [1], [0, 0, 1, 1], [], []>, precision = #tpu.contract_precision<fp32>} : vector<8x8xf32>, vector<8x80xf32>, vector<8x80xf32> -> vector<8x80xf32>
    %25 = tpu.concatenate %22, %24 in 0 : vector<8x80xf32>, vector<8x80xf32> -> vector<16x80xf32>
    %26 = math.tanh %25 : vector<16x80xf32>
    %c0_18 = arith.constant 0 : index
    %c0_19 = arith.constant 0 : index
    %27 = vector.load %arg8[%c0_18, %c0_19] : memref<80x128xf32, #tpu.memory_space<vmem>>, vector<80x128xf32>
    %cst_20 = arith.constant dense<0.000000e+00> : vector<16x128xf32>
    %28 = tpu.matmul %26, %27, %cst_20 {dimension_numbers = #tpu.dot_dimension_numbers<[1], [0], [0], [1], [0, 0, 1, 1], [], []>, precision = #tpu.contract_precision<fp32>} : vector<16x80xf32>, vector<80x128xf32>, vector<16x128xf32> -> vector<16x128xf32>
    %c0_21 = arith.constant 0 : index
    %c0_22 = arith.constant 0 : index
    %29 = vector.load %arg9[%c0_21, %c0_22] : memref<1x128xf32, #tpu.memory_space<vmem>>, vector<1x128xf32>
    %30 = vector.broadcast %29 : vector<1x128xf32> to vector<16x128xf32>
    %31 = arith.addf %28, %30 : vector<16x128xf32>
    %c0_23 = arith.constant 0 : index
    %c0_24 = arith.constant 0 : index
    %32 = vector.load %arg10[%c0_23, %c0_24] : memref<80x128xf32, #tpu.memory_space<vmem>>, vector<80x128xf32>
    %cst_25 = arith.constant dense<0.000000e+00> : vector<16x128xf32>
    %33 = tpu.matmul %26, %32, %cst_25 {dimension_numbers = #tpu.dot_dimension_numbers<[1], [0], [0], [1], [0, 0, 1, 1], [], []>, precision = #tpu.contract_precision<fp32>} : vector<16x80xf32>, vector<80x128xf32>, vector<16x128xf32> -> vector<16x128xf32>
    %c0_26 = arith.constant 0 : index
    %c0_27 = arith.constant 0 : index
    %34 = vector.load %arg11[%c0_26, %c0_27] : memref<1x128xf32, #tpu.memory_space<vmem>>, vector<1x128xf32>
    %35 = vector.broadcast %34 : vector<1x128xf32> to vector<16x128xf32>
    %36 = arith.addf %33, %35 : vector<16x128xf32>
    %37 = arith.negf %36 : vector<16x128xf32>
    %38 = math.exp %37 : vector<16x128xf32>
    %cst_28 = arith.constant 1.000000e+00 : f32
    %39 = vector.broadcast %cst_28 : f32 to vector<16x128xf32>
    %40 = arith.addf %39, %38 : vector<16x128xf32>
    %41 = arith.divf %39, %40 : vector<16x128xf32>
    %42 = arith.mulf %41, %31 : vector<16x128xf32>
    %43 = math.tanh %42 : vector<16x128xf32>
    %c0_29 = arith.constant 0 : index
    %c0_30 = arith.constant 0 : index
    %44 = vector.load %arg12[%c0_29, %c0_30] : memref<16x128xf32, #tpu.memory_space<vmem>>, vector<16x128xf32>
    tpu.vector_store %arg12[%c0_29, %c0_30], %43 {strides = array<i32>} : memref<16x128xf32, #tpu.memory_space<vmem>>, vector<16x128xf32>,
    return
  }
  func.func @transform_0(%arg0: i32) -> (i32, i32) {
    %c0_i32 = arith.constant 0 : i32
    %c0_i32_0 = arith.constant 0 : i32
    %c0_i32_1 = arith.constant 0 : i32
    return %c0_i32, %c0_i32_0 : i32, i32
  }
  func.func @transform_1(%arg0: i32) -> (i32, i32) {
    %c0_i32 = arith.constant 0 : i32
    %c0_i32_0 = arith.constant 0 : i32
    %c0_i32_1 = arith.constant 0 : i32
    return %c0_i32, %c0_i32_0 : i32, i32
  }
  func.func @transform_2(%arg0: i32) -> (i32, i32) {
    %c0_i32 = arith.constant 0 : i32
    %c0_i32_0 = arith.constant 0 : i32
    %c0_i32_1 = arith.constant 0 : i32
    return %c0_i32, %c0_i32_0 : i32, i32
  }
  func.func @transform_3(%arg0: i32) -> (i32, i32) {
    %c0_i32 = arith.constant 0 : i32
    %c0_i32_0 = arith.constant 0 : i32
    %c0_i32_1 = arith.constant 0 : i32
    return %c0_i32, %c0_i32_0 : i32, i32
  }
  func.func @transform_4(%arg0: i32) -> (i32, i32) {
    %c0_i32 = arith.constant 0 : i32
    %c0_i32_0 = arith.constant 0 : i32
    %c0_i32_1 = arith.constant 0 : i32
    return %c0_i32, %c0_i32_0 : i32, i32
  }
  func.func @transform_5(%arg0: i32) -> (i32, i32) {
    %c0_i32 = arith.constant 0 : i32
    %c0_i32_0 = arith.constant 0 : i32
    %c0_i32_1 = arith.constant 0 : i32
    return %c0_i32, %c0_i32_0 : i32, i32
  }
  func.func @transform_6(%arg0: i32) -> (i32, i32) {
    %c0_i32 = arith.constant 0 : i32
    %c0_i32_0 = arith.constant 0 : i32
    %c0_i32_1 = arith.constant 0 : i32
    return %c0_i32, %c0_i32_0 : i32, i32
  }
  func.func @transform_7(%arg0: i32) -> (i32, i32) {
    %c0_i32 = arith.constant 0 : i32
    %c0_i32_0 = arith.constant 0 : i32
    %c0_i32_1 = arith.constant 0 : i32
    return %c0_i32, %c0_i32_0 : i32, i32
  }
  func.func @transform_8(%arg0: i32) -> (i32, i32) {
    %c0_i32 = arith.constant 0 : i32
    %c0_i32_0 = arith.constant 0 : i32
    %c0_i32_1 = arith.constant 0 : i32
    return %c0_i32, %c0_i32_0 : i32, i32
  }
  func.func @transform_9(%arg0: i32) -> (i32, i32) {
    %c0_i32 = arith.constant 0 : i32
    %c0_i32_0 = arith.constant 0 : i32
    %c0_i32_1 = arith.constant 0 : i32
    return %c0_i32, %c0_i32_0 : i32, i32
  }
  func.func @transform_10(%arg0: i32) -> (i32, i32) {
    %c0_i32 = arith.constant 0 : i32
    %c0_i32_0 = arith.constant 0 : i32
    %c0_i32_1 = arith.constant 0 : i32
    return %c0_i32, %c0_i32_0 : i32, i32
  }
  func.func @transform_11(%arg0: i32) -> (i32, i32) {
    %c0_i32 = arith.constant 0 : i32
    %c0_i32_0 = arith.constant 0 : i32
    %c0_i32_1 = arith.constant 0 : i32
    return %c0_i32, %c0_i32_0 : i32, i32
  }
}

</mosaic_0001>

<bundles_post_ra>
// kernel: stgcn_block_forward.1
= control target key start
LH: loop header
LB: loop body
LE: loop exit
PB: predicated region body
PF: predicated region fallthrough
CT: control target
= control target key end

     0   :  { %16 = vsyncpa [#allocation3], 0  ;;  %s7067_s0 = inlined_call_operand.vmem [shape: f32[16,48], index: 0, kind: input, shape index: {}]   ;;  %s7068_s1 = inlined_call_operand.vmem [shape: f32[8,8], index: 1, kind: input, shape index: {}]   ;;  %s7069_s2 = inlined_call_operand.vmem [shape: f32[48,160], index: 2, kind: input, shape index: {}]   ;;  %s7070_s3 = inlined_call_operand.vmem [shape: f32[1,160], index: 3, kind: input, shape index: {}]   ;;  %s7071_s4 = inlined_call_operand.vmem [shape: f32[48,160], index: 4, kind: input, shape index: {}]   ;;  %s7072_s5 = inlined_call_operand.vmem [shape: f32[1,160], index: 5, kind: input, shape index: {}]   ;;  %s7073_s6 = inlined_call_operand.vmem [shape: f32[160,80], index: 6, kind: input, shape index: {}]   ;;  %s7074_s7 = inlined_call_operand.hbm [shape: f32[80,128], index: 7, kind: input, shape index: {}]   ;;  %s7075_s8 = inlined_call_operand.vmem [shape: f32[1,128], index: 8, kind: input, shape index: {}]   ;;  %s7076_s9 = inlined_call_operand.hbm [shape: f32[80,128], index: 9, kind: input, shape index: {}]   ;;  %s7077_s10 = inlined_call_operand.vmem [shape: f32[1,128], index: 10, kind: input, shape index: {}]   ;;  %s7078_s11 = inlined_call_operand.vmem [shape: f32[16,128], index: 11, kind: output, shape index: {}]  }
   0x1   :  { %17 = vsyncpa [#allocation5], 0  ;;  %s5690_s17 = smov [#allocation2]   ;;  %s5642_s21 = scalar_lea.hbm %s7074_s7, 1280 }
   0x2   :  { %s37_s18 = sshll.u32 %s5690_s17, 4  ;;  %p5643_p0 = scmp.ne.s32.totalorder %s7074_s7, %s5642_s21  ;;  %s38_s18 = int_to_ptr.vmem [resolvable:$true] %s37_s18 }
   0x3   :  { %p5646_p1 = scmp.lt.u32.totalorder %s5642_s21, %s7074_s7 }
   0x5   :  { %p5648_p2 = pnand %p5646_p1, %p5643_p0 }
   0x7   :  { %5651 = shalt.err (!%p5648_p2)
}
   0x8   :  { %s5652_s26 = scalar_lea.vmem %s38_s18, 1280  ;;  %p5657_p4 = scmp.lt.s32.totalorder %s38_s18, %s38_s18 }
   0x9   :  { %p5653_p3 = scmp.ne.s32.totalorder %s38_s18, %s5652_s26  ;;  %p5658_p5 = scmp.lt.s32.totalorder %s5652_s26, %s5652_s26 }
   0xb   :  { %p5659_p6 = por %p5658_p5, %p5657_p4 }
   0xd   :  { %p5660_p7 = pnand %p5659_p6, %p5653_p3 }
   0xf   :  { %5663 = shalt.err (!%p5660_p7)
}
  0x10   :  { %s5691_s27 = smov 128   ;;  %s5692_s28 = smov 8  }
  0x11   :  { %43 = dma.hbm_to_vmem [thread:$0]  %s7074_s7, 1280, %s38_s18, [#allocation3], %s5691_s27, %s5691_s27, %s5692_s28  }
  0x12   :  { %s5693_s12 = smov [#allocation4]   ;;  %s5664_s16 = scalar_lea.hbm %s7076_s9, 1280 }
  0x13   :  { %s51_s13 = sshll.u32 %s5693_s12, 4  ;;  %p5665_p8 = scmp.ne.s32.totalorder %s7076_s9, %s5664_s16  ;;  %s52_s13 = int_to_ptr.vmem [resolvable:$true] %s51_s13 }
  0x14   :  { %p5668_p9 = scmp.lt.u32.totalorder %s5664_s16, %s7076_s9 }
  0x16   :  { %p5670_p10 = pnand %p5668_p9, %p5665_p8 }
  0x18   :  { %5673 = shalt.err (!%p5670_p10)
}
  0x19   :  { %s5674_s22 = scalar_lea.vmem %s52_s13, 1280  ;;  %p5679_p12 = scmp.lt.s32.totalorder %s52_s13, %s52_s13 }
  0x1a   :  { %p5675_p11 = scmp.ne.s32.totalorder %s52_s13, %s5674_s22  ;;  %p5680_p13 = scmp.lt.s32.totalorder %s5674_s22, %s5674_s22 }
  0x1c   :  { %p5681_p0 = por %p5680_p13, %p5679_p12 }
  0x1e   :  { %p5682_p1 = pnand %p5681_p0, %p5675_p11 }
  0x20   :  { %5685 = shalt.err (!%p5682_p1)
}
  0x21   :  { %57 = dma.hbm_to_vmem [thread:$0]  %s7076_s9, 1280, %s52_s13, [#allocation5], %s5691_s27, %s5691_s27, %s5692_s28  }
  0x22   :  { %5686 = dma.done.wait [#allocation3], 1280  }
  0x23   :  { %5687 = vsyncadd [#allocation3], 4294966016 }
  0x24   :  { %5688 = dma.done.wait [#allocation5], 1280  }
  0x25   :  { %5689 = vsyncadd [#allocation5], 4294966016  ;;  %v7097_v0 = vmov 0.0   ;;  %v69_v1 = vld [vmem:[%s7069_s2 + $0x8] sm:$0xff]  ;;  %v71_v2 = vld [vmem:[%s7069_s2 + $0x18] sm:$0xff]  ;;  %vm92_vm0 = vcmask 392192  }
  0x26   :  { %175 = vmatprep.mubr.f32.mxu0 %v7097_v0  ;;  %843 = vmatprep.mubr.f32.mxu1 %v7097_v0  ;;  %v744_v3 = vld [vmem:[%s7071_s4 + $0x8] sm:$0xff]  ;;  %v99_v4 = vand.u32 4294901760, %v69_v1  ;;  %v103_v5 = vand.u32 4294901760, %v71_v2  ;;  %v746_v6 = vld [vmem:[%s7071_s4 + $0x18] sm:$0xff]  ;;  %v68_v8 = vld [vmem:[%s7069_s2] sm:$0xff]  ;;  %vm1463_vm1 = vcmask 261120  }
  0x27   :  { %v767_v7 = vand.u32 4294901760, %v744_v3  ;;  %v70_v9 = vld [vmem:[%s7069_s2 + $0x10] sm:$0xff]  ;;  %v771_v10 = vand.u32 4294901760, %v746_v6  ;;  %v101_v11 = vand.u32 4294901760, %v68_v8  ;;  %v743_v13 = vld [vmem:[%s7071_s4] sm:$0xff]  ;;  %v73_v15 = vld [vmem:[%s7069_s2 + $0x28] sm:$0xff] }
  0x28   :  { %v105_v12 = vand.u32 4294901760, %v70_v9  ;;  %v745_v14 = vld [vmem:[%s7071_s4 + $0x10] sm:$0xff]  ;;  %v5810_v16 = vpack.c.bf16 %v103_v5, %v99_v4  ;;  %v5812_v17 = vsub.f32 %v69_v1, %v99_v4  ;;  %v5814_v18 = vsub.f32 %v71_v2, %v103_v5  ;;  %v75_v20 = vld [vmem:[%s7069_s2 + $0x38] sm:$0xff]  ;;  %v748_v21 = vld [vmem:[%s7071_s4 + $0x28] sm:$0xff] }
  0x29   :  { %v5816_v19 = vsub.f32 %v744_v3, %v767_v7  ;;  %v750_v22 = vld [vmem:[%s7071_s4 + $0x38] sm:$0xff]  ;;  %v5827_v23 = vpack.c.bf16 %v771_v10, %v767_v7  ;;  %v5829_v24 = vsub.f32 %v746_v6, %v771_v10  ;;  %v5833_v26 = vsub.f32 %v68_v8, %v101_v11  ;;  %v72_v27 = vld [vmem:[%s7069_s2 + $0x20] sm:$0xff]  ;;  %v74_v32 = vld [vmem:[%s7069_s2 + $0x30] sm:$0xff] }
  0x2a   :  { %v5831_v25 = vpack.c.bf16 %v105_v12, %v101_v11  ;;  %4921 = vmatprep.subr.bf16.mxu0 %v5810_v16  ;;  %v5839_v28 = vsub.f32 %v70_v9, %v105_v12  ;;  %v769_v29 = vand.u32 4294901760, %v743_v13  ;;  %v773_v30 = vand.u32 4294901760, %v745_v14  ;;  %v747_v37 = vld [vmem:[%s7071_s4 + $0x20] sm:$0xff]  ;;  %v749_v38 = vld [vmem:[%s7071_s4 + $0x30] sm:$0xff]  ;;  %v77_v43 = vld [vmem:[%s7069_s2 + $0x48] sm:$0xff] }
  0x2b   :  { %v107_v31 = vand.u32 4294901760, %v73_v15  ;;  %4993 = vmatprep.subr.bf16.mxu1 %v5827_v23  ;;  %v111_v33 = vand.u32 4294901760, %v75_v20  ;;  %v775_v34 = vand.u32 4294901760, %v748_v21  ;;  %v779_v35 = vand.u32 4294901760, %v750_v22  ;;  %v79_v44 = vld [vmem:[%s7069_s2 + $0x58] sm:$0xff]  ;;  %v752_v45 = vld [vmem:[%s7071_s4 + $0x48] sm:$0xff] }
  0x2c   :  { %4923 = vmatpush1.bf16.msra.mxu0 %v5831_v25  ;;  %v109_v36 = vand.u32 4294901760, %v72_v27  ;;  %v5852_v39 = vpack.c.bf16 %v773_v30, %v769_v29  ;;  %v5854_v40 = vsub.f32 %v743_v13, %v769_v29  ;;  %v5856_v41 = vsub.f32 %v745_v14, %v773_v30  ;;  %v754_v50 = vld [vmem:[%s7071_s4 + $0x58] sm:$0xff]  ;;  %v76_v59 = vld [vmem:[%s7069_s2 + $0x40] sm:$0xff]  ;;  %v78_v1 = vld [vmem:[%s7069_s2 + $0x50] sm:$0xff] }
  0x2d   :  { %v5858_v42 = vsub.f32 %v73_v15, %v107_v31  ;;  %v5869_v46 = vpack.c.bf16 %v111_v33, %v107_v31  ;;  %v5871_v47 = vsub.f32 %v75_v20, %v111_v33  ;;  %v5873_v48 = vpack.c.bf16 %v779_v35, %v775_v34  ;;  %v751_v2 = vld [vmem:[%s7071_s4 + $0x40] sm:$0xff]  ;;  %v753_v3 = vld [vmem:[%s7071_s4 + $0x50] sm:$0xff] }
  0x2e   :  { %v5875_v49 = vsub.f32 %v748_v21, %v775_v34  ;;  %4995 = vmatpush1.bf16.msra.mxu1 %v5852_v39  ;;  %v5881_v51 = vsub.f32 %v750_v22, %v779_v35  ;;  %v113_v52 = vand.u32 4294901760, %v74_v32  ;;  %v5883_v53 = vsub.f32 %v72_v27, %v109_v36  ;;  %v66_v29 = vld [vmem:[%s7067_s0] sm:$0xff] }
  0x2f   :  { %v777_v54 = vand.u32 4294901760, %v747_v37  ;;  %4925 = vmatprep.subr.bf16.mxu0 %v5869_v46  ;;  %4997 = vmatprep.subr.bf16.mxu1 %v5873_v48  ;;  %v781_v55 = vand.u32 4294901760, %v749_v38  ;;  %v115_v56 = vand.u32 4294901760, %v77_v43  ;;  %v119_v57 = vand.u32 4294901760, %v79_v44 }
  0x30   :  { %v783_v58 = vand.u32 4294901760, %v752_v45  ;;  %v5890_v60 = vpack.c.bf16 %v113_v52, %v109_v36  ;;  %v5892_v61 = vsub.f32 %v74_v32, %v113_v52  ;;  %v787_v63 = vand.u32 4294901760, %v754_v50 }
  0x31   :  { %v5894_v62 = vsub.f32 %v747_v37, %v777_v54  ;;  %v5905_v4 = vpack.c.bf16 %v781_v55, %v777_v54  ;;  %v5907_v5 = vsub.f32 %v749_v38, %v781_v55  ;;  %v5909_v6 = vpack.c.bf16 %v119_v57, %v115_v56 }
  0x32   :  { %v5911_v7 = vsub.f32 %v77_v43, %v115_v56  ;;  %4927 = vmatpush1.bf16.msra.mxu0 %v5890_v60  ;;  %v5914_v8 = vsub.f32 %v79_v44, %v119_v57  ;;  %v5916_v9 = vpack.c.bf16 %v787_v63, %v783_v58  ;;  %v5918_v10 = vsub.f32 %v752_v45, %v783_v58 }
  0x33   :  { %v5920_v11 = vsub.f32 %v754_v50, %v787_v63  ;;  %4999 = vmatpush1.bf16.msra.mxu1 %v5905_v4  ;;  %4929 = vmatprep.subr.bf16.mxu0 %v5909_v6  ;;  %v117_v12 = vand.u32 4294901760, %v76_v59  ;;  %v121_v13 = vand.u32 4294901760, %v78_v1  ;;  %v785_v14 = vand.u32 4294901760, %v751_v2 }
  0x34   :  { %v789_v15 = vand.u32 4294901760, %v753_v3  ;;  %5001 = vmatprep.subr.bf16.mxu1 %v5916_v9  ;;  %v200_v20 = vand.u32 4294901760, %v5812_v17  ;;  %v212_v21 = vand.u32 4294901760, %v5814_v18  ;;  %v868_v22 = vand.u32 4294901760, %v5816_v19 }
  0x35   :  { %v880_v27 = vand.u32 4294901760, %v5829_v24  ;;  %v5932_v30 = vpack.c.bf16 %v121_v13, %v117_v12  ;;  %v5934_v31 = vsub.f32 %v76_v59, %v117_v12  ;;  %v5936_v32 = vsub.f32 %v78_v1, %v121_v13 }
  0x36   :  { %v5938_v33 = vpack.c.bf16 %v789_v15, %v785_v14  ;;  %v5940_v34 = vsub.f32 %v751_v2, %v785_v14  ;;  %v5942_v35 = vsub.f32 %v753_v3, %v789_v15  ;;  %v201_v36 = vsub.f32 %v5812_v17, %v200_v20 }
  0x37   :  { %v213_v37 = vsub.f32 %v5814_v18, %v212_v21  ;;  %4931 = vmatpush1.bf16.msra.mxu0 %v5932_v30  ;;  %v869_v38 = vsub.f32 %v5816_v19, %v868_v22  ;;  %v881_v43 = vsub.f32 %v5829_v24, %v880_v27  ;;  %v94_v44 = vsel %vm92_vm0, %v66_v29, 0 }
  0x38   :  { %5003 = vmatpush1.bf16.msra.mxu1 %v5938_v33  ;;  %v7092_v45 = vand.u32 4294901760, %v5833_v26  ;;  %v202_v50 = vand.u32 4294901760, %v201_v36  ;;  %v5960_v54 = vand.u32 4294901760, %v94_v44  ;;  %v7082_v55 = vand.u32 4294901760, %v5839_v28 }
  0x39   :  { %v214_v52 = vand.u32 4294901760, %v213_v37  ;;  %v870_v56 = vand.u32 4294901760, %v869_v38  ;;  %v882_v57 = vand.u32 4294901760, %v881_v43  ;;  %v7081_v59 = vand.u32 4294901760, %v5854_v40 }
  0x3a   :  { %v207_v58 = vsub.f32 %v5833_v26, %v7092_v45  ;;  %v5968_v1 = vsub.f32 %v94_v44, %v5960_v54  ;;  %v219_v2 = vsub.f32 %v5839_v28, %v7082_v55  ;;  %v7080_v3 = vand.u32 4294901760, %v5856_v41 }
  0x3b   :  { %v4932_v63 = vpack.c.bf16 %v214_v52, %v202_v50  ;;  %v5004_v12 = vpack.c.bf16 %v882_v57, %v870_v56  ;;  %v875_v14 = vsub.f32 %v5854_v40, %v7081_v59  ;;  %v7079_v15 = vand.u32 4294901760, %v5858_v42 }
  0x3c   :  { %v208_v13 = vand.u32 4294901760, %v207_v58  ;;  %v5979_v29 = vand.u32 4294901760, %v5968_v1  ;;  %v220_v36 = vand.u32 4294901760, %v219_v2  ;;  %v887_v37 = vsub.f32 %v5856_v41, %v7080_v3 }
  0x3d   :  { %4933 = vmatprep.subr.bf16.mxu0 %v4932_v63  ;;  %v7083_v38 = vand.u32 4294901760, %v5871_v47  ;;  %5005 = vmatprep.subr.bf16.mxu1 %v5004_v12  ;;  %v876_v43 = vand.u32 4294901760, %v875_v14  ;;  %v225_v44 = vsub.f32 %v5858_v42, %v7079_v15  ;;  %v7084_v50 = vand.u32 4294901760, %v5875_v49 }
  0x3e   :  { %v7085_v52 = vand.u32 4294901760, %v5881_v51  ;;  %v179_v56 = vsub.f32 %v5968_v1, %v5979_v29  ;;  %v4934_v57 = vpack.c.bf16 %v220_v36, %v208_v13  ;;  %v888_v58 = vand.u32 4294901760, %v887_v37 }
  0x3f   :  { %v237_v63 = vsub.f32 %v5871_v47, %v7083_v38  ;;  %v226_v2 = vand.u32 4294901760, %v225_v44  ;;  %v893_v12 = vsub.f32 %v5875_v49, %v7084_v50  ;;  %v7091_v15 = vand.u32 4294901760, %v5883_v53 }
  0x40   :  { %v905_v14 = vsub.f32 %v5881_v51, %v7085_v52  ;;  %v180_v3 = vand.u32 4294901760, %v179_v56  ;;  %v5006_v59 = vpack.c.bf16 %v888_v58, %v876_v43  ;;  %v7089_v13 = vand.u32 4294901760, %v5892_v61  ;;  %v67_v58 = vld [vmem:[%s7067_s0 + $0x8] sm:$0xff] }
  0x41   :  { %v238_v55 = vand.u32 4294901760, %v237_v63  ;;  %v894_v36 = vand.u32 4294901760, %v893_v12  ;;  %v231_v44 = vsub.f32 %v5883_v53, %v7091_v15  ;;  %v7087_v38 = vand.u32 4294901760, %v5894_v62 }
  0x42   :  { %v906_v37 = vand.u32 4294901760, %v905_v14  ;;  %181 = vmatmul.mubr.f32.vlgmr.msra.gmra.mrb[0].mxu0 %v180_v3  ;;  %849 = vmatmul.mubr.f32.vlgmr.msra.gmra.mrb[0].mxu1 %v180_v3  ;;  %v243_v52 = vsub.f32 %v5892_v61, %v7089_v13  ;;  %v7086_v43 = vand.u32 4294901760, %v5907_v5  ;;  %v7088_v56 = vand.u32 4294901760, %v5911_v7 }
  0x43   :  { %v4936_v50 = vpack.c.bf16 %v238_v55, %v226_v2  ;;  %4935 = vmatpush1.bf16.msra.mxu0 %v4934_v57  ;;  %5007 = vmatpush1.bf16.msra.mxu1 %v5006_v59  ;;  %v232_v12 = vand.u32 4294901760, %v231_v44  ;;  %v899_v55 = vsub.f32 %v5894_v62, %v7087_v38  ;;  %v7090_v3 = vand.u32 4294901760, %v5914_v8 }
  0x44   :  { %v5008_v63 = vpack.c.bf16 %v906_v37, %v894_v36  ;;  %v244_v2 = vand.u32 4294901760, %v243_v52  ;;  %v911_v14 = vsub.f32 %v5907_v5, %v7086_v43  ;;  %186 = vmatprep.mubr.f32.mxu0 %v7097_v0  ;;  %v249_v59 = vsub.f32 %v5911_v7, %v7088_v56  ;;  %854 = vmatprep.mubr.f32.mxu1 %v7097_v0 }
  0x45   :  { %4937 = vmatprep.subr.bf16.mxu0 %v4936_v50  ;;  %v916_v57 = vand.u32 4294901760, %v5918_v10  ;;  %v900_v36 = vand.u32 4294901760, %v899_v55  ;;  %v261_v37 = vsub.f32 %v5914_v8, %v7090_v3  ;;  %v7096_v50 = vand.u32 4294901760, %v5920_v11 }
  0x46   :  { %5009 = vmatprep.subr.bf16.mxu1 %v5008_v63  ;;  %v97_v52 = vsel %vm92_vm0, %v67_v58, 0  ;;  %v4938_v44 = vpack.c.bf16 %v244_v2, %v232_v12  ;;  %v912_v43 = vand.u32 4294901760, %v911_v14  ;;  %v250_v38 = vand.u32 4294901760, %v249_v59 }
  0x47   :  { %v917_v56 = vsub.f32 %v5918_v10, %v916_v57  ;;  %v262_v13 = vand.u32 4294901760, %v261_v37  ;;  %v929_v63 = vsub.f32 %v5920_v11, %v7096_v50  ;;  %v6039_v55 = vand.u32 4294901760, %v97_v52 }
  0x48   :  { %v7094_v3 = vand.u32 4294901760, %v5934_v31  ;;  %4939 = vmatpush1.bf16.msra.mxu0 %v4938_v44  ;;  %v5010_v15 = vpack.c.bf16 %v912_v43, %v900_v36  ;;  %v7093_v58 = vand.u32 4294901760, %v5936_v32  ;;  %v7095_v12 = vand.u32 4294901760, %v5940_v34 }
  0x49   :  { %v918_v45 = vand.u32 4294901760, %v917_v56  ;;  %v4940_v2 = vpack.c.bf16 %v262_v13, %v250_v38  ;;  %v930_v14 = vand.u32 4294901760, %v929_v63  ;;  %v6045_v59 = vsub.f32 %v97_v52, %v6039_v55 }
  0x4a   :  { %v255_v37 = vsub.f32 %v5934_v31, %v7094_v3  ;;  %5011 = vmatpush1.bf16.msra.mxu1 %v5010_v15  ;;  %v267_v44 = vsub.f32 %v5936_v32, %v7093_v58  ;;  %v923_v43 = vsub.f32 %v5940_v34, %v7095_v12  ;;  %v934_v56 = vand.u32 4294901760, %v5942_v35 }
  0x4b   :  { %4941 = vmatprep.subr.bf16.mxu0 %v4940_v2  ;;  %v5012_v38 = vpack.c.bf16 %v930_v14, %v918_v45  ;;  %v6058_v13 = vand.u32 4294901760, %v6045_v59  ;;  %v4944_v45 = vpack.c.bf16 %v5814_v18, %v5812_v17  ;;  %v5016_v14 = vpack.c.bf16 %v5829_v24, %v5816_v19 }
  0x4c   :  { %v256_v36 = vand.u32 4294901760, %v255_v37  ;;  %v268_v52 = vand.u32 4294901760, %v267_v44  ;;  %v924_v63 = vand.u32 4294901760, %v923_v43  ;;  %v935_v15 = vsub.f32 %v5942_v35, %v934_v56 }
  0x4d   :  { %5013 = vmatprep.subr.bf16.mxu1 %v5012_v38  ;;  %v190_v58 = vsub.f32 %v6045_v59, %v6058_v13  ;;  %v4946_v37 = vpack.c.bf16 %v5839_v28, %v5833_v26  ;;  %v5018_v44 = vpack.c.bf16 %v5856_v41, %v5854_v40  ;;  %v4952_v43 = vpack.c.bf16 %v5914_v8, %v5911_v7 }
  0x4e   :  { %v4942_v3 = vpack.c.bf16 %v268_v52, %v256_v36  ;;  %v936_v12 = vand.u32 4294901760, %v935_v15  ;;  %v5024_v38 = vpack.c.bf16 %v5920_v11, %v5918_v10  ;;  %v4954_v36 = vpack.c.bf16 %v5936_v32, %v5934_v31 }
  0x4f   :  { %v191_v50 = vand.u32 4294901760, %v190_v58  ;;  %v5020_v58 = vpack.c.bf16 %v5881_v51, %v5875_v49  ;;  %v5026_v52 = vpack.c.bf16 %v5942_v35, %v5940_v34  ;;  %v7124_v17 = vand.u32 4294901760, %v5839_v28  ;;  %v1450_v35 = vld [vmem:[%s7073_s6 + $0x38] sm:$0xff] }
  0x50   :  { %4943 = vmatpush1.bf16.msra.mxu0 %v4942_v3  ;;  %v5014_v2 = vpack.c.bf16 %v936_v12, %v924_v63  ;;  %v4948_v3 = vpack.c.bf16 %v5871_v47, %v5858_v42  ;;  %v5022_v12 = vpack.c.bf16 %v5907_v5, %v5894_v62  ;;  %v5040_v63 = vpack.c.bf16 %v880_v27, %v868_v22 }
  0x51   :  { %192 = vmatmul.mubr.f32.gmra.mrb[2].mxu0 %v191_v50  ;;  %860 = vmatmul.mubr.f32.gmra.mrb[2].mxu1 %v191_v50  ;;  %v4950_v50 = vpack.c.bf16 %v5892_v61, %v5883_v53  ;;  %v7125_v18 = vand.u32 4294901760, %v5854_v40  ;;  %v7126_v19 = vand.u32 4294901760, %v5856_v41  ;;  %v7127_v24 = vand.u32 4294901760, %v5858_v42 }
  0x52   :  { %5015 = vmatpush1.bf16.msra.mxu1 %v5014_v2  ;;  %322 = vmatprep.mubr.f32.mxu0 %v7097_v0  ;;  %v7129_v27 = vand.u32 4294901760, %v5875_v49  ;;  %v7131_v28 = vand.u32 4294901760, %v5883_v53  ;;  %v7132_v40 = vand.u32 4294901760, %v5892_v61  ;;  %v7133_v42 = vand.u32 4294901760, %v5894_v62 }
  0x53   :  { %4945 = vmatprep.subr.bf16.mxu0 %v4944_v45  ;;  %990 = vmatprep.mubr.f32.mxu1 %v7097_v0  ;;  %v7130_v45 = vand.u32 4294901760, %v5881_v51  ;;  %v7135_v49 = vand.u32 4294901760, %v5911_v7  ;;  %v7136_v51 = vand.u32 4294901760, %v5914_v8  ;;  %v7138_v61 = vand.u32 4294901760, %v5934_v31 }
  0x54   :  { %5017 = vmatprep.subr.bf16.mxu1 %v5016_v14  ;;  %v4974_v41 = vpack.c.bf16 %v7132_v40, %v7131_v28  ;;  %v7139_v62 = vand.u32 4294901760, %v5936_v32  ;;  %v7140_v7 = vand.u32 4294901760, %v5940_v34  ;;  %v1449_v34 = vld [vmem:[%s7073_s6 + $0x30] sm:$0xff]  ;;  %vm5696_vm2 = vmmov 0  }
  0x55   :  { %324 = vmatmul.mubr.f32.vlgmr.msra.gmra.mrb[0].mxu0 %v5960_v54  ;;  %992 = vmatmul.mubr.f32.vlgmr.msra.gmra.mrb[0].mxu1 %v5960_v54  ;;  %v4976_v14 = vpack.c.bf16 %v7136_v51, %v7135_v49  ;;  %vm2233_vm3 = vcmask 64512   ;;  %vm3148_vm4 = vcmask 654336  }
  0x56   :  { %4947 = vmatpush1.bf16.msra.mxu0 %v4946_v37  ;;  %5019 = vmatpush1.bf16.msra.mxu1 %v5018_v44  ;;  %v5050_v8 = vpack.c.bf16 %v934_v56, %v7140_v7  ;;  %v1451_v56 = vld [vmem:[%s7073_s6 + $0x40] sm:$0xff] }
  0x57   :  { %4949 = vmatprep.subr.bf16.mxu0 %v4948_v3  ;;  %5021 = vmatprep.subr.bf16.mxu1 %v5020_v58  ;;  %v1495_v37 = vand.u32 4294901760, %v1451_v56  ;;  %v1453_v58 = vld [vmem:[%s7073_s6 + $0x50] sm:$0xff] }
  0x58   :  { %329 = vmatprep.mubr.f32.mxu0 %v7097_v0  ;;  %997 = vmatprep.mubr.f32.mxu1 %v7097_v0 }
  0x59   :  { %331 = vmatmul.mubr.f32.gmra.mrb[2].mxu0 %v6039_v55  ;;  %999 = vmatmul.mubr.f32.gmra.mrb[2].mxu1 %v6039_v55 }
  0x5a   :  { %4951 = vmatpush1.bf16.msra.mxu0 %v4950_v50  ;;  %5023 = vmatpush1.bf16.msra.mxu1 %v5022_v12  ;;  %v1454_v50 = vld [vmem:[%s7073_s6 + $0x58] sm:$0xff]  ;;  %v1501_v12 = vand.u32 4294901760, %v1453_v58 }
  0x5b   :  { %4953 = vmatprep.subr.bf16.mxu0 %v4952_v43  ;;  %5025 = vmatprep.subr.bf16.mxu1 %v5024_v38  ;;  %v1504_v43 = vand.u32 4294901760, %v1454_v50 }
  0x5c   :  { %425 = vmatprep.mubr.f32.mxu0 %v7097_v0  ;;  %1093 = vmatprep.mubr.f32.mxu1 %v7097_v0  ;;  %v6298_v40 = vsub.f32 %v1453_v58, %v1501_v12 }
  0x5d   :  { %v6259_v38 = vpack.c.bf16 %v1504_v43, %v1501_v12 }
  0x5e   :  { %4955 = vmatpush1.bf16.msra.mxu0 %v4954_v36  ;;  %5027 = vmatpush1.bf16.msra.mxu1 %v5026_v52  ;;  %v1455_v36 = vld [vmem:[%s7073_s6 + $0x60] sm:$0xff]  ;;  %v1456_v52 = vld [vmem:[%s7073_s6 + $0x68] sm:$0xff] }
  0x5f   :  { %4957 = vmatprep.subr.bf16.mxu0 %v5810_v16  ;;  %5029 = vmatprep.subr.bf16.mxu1 %v5827_v23 }
  0x61   :  { %428 = vmatmul.mubr.f32.vlgmr.msra.gmra.mrb[0].mxu0 %v5968_v1  ;;  %1096 = vmatmul.mubr.f32.vlgmr.msra.gmra.mrb[0].mxu1 %v5968_v1  ;;  %v4968_v1 = vpack.c.bf16 %v212_v21, %v200_v20  ;;  %v5042_v20 = vpack.c.bf16 %v7126_v19, %v7125_v18  ;;  %v7128_v21 = vand.u32 4294901760, %v5871_v47  ;;  %v7134_v47 = vand.u32 4294901760, %v5907_v5  ;;  %v1457_v19 = vld [vmem:[%s7073_s6 + $0x70] sm:$0xff] }
  0x62   :  { %4959 = vmatpush1.bf16.msra.mxu0 %v5831_v25  ;;  %5031 = vmatpush1.bf16.msra.mxu1 %v5852_v39  ;;  %v4978_v5 = vpack.c.bf16 %v7139_v62, %v7138_v61 }
  0x63   :  { %4961 = vmatprep.subr.bf16.mxu0 %v5869_v46  ;;  %5033 = vmatprep.subr.bf16.mxu1 %v5873_v48  ;;  %v4972_v22 = vpack.c.bf16 %v7128_v21, %v7127_v24  ;;  %v5046_v2 = vpack.c.bf16 %v7134_v47, %v7133_v42  ;;  %v1460_v42 = vld [vmem:[%s7073_s6 + $0x88] sm:$0xff]  ;;  %v1461_v47 = vld [vmem:[%s7073_s6 + $0x90] sm:$0xff] }
  0x64   :  { %433 = vmatprep.mubr.f32.mxu0 %v7097_v0  ;;  %1101 = vmatprep.mubr.f32.mxu1 %v7097_v0  ;;  %v1525_v7 = vand.u32 4294901760, %v1461_v47 }
  0x65   :  { %436 = vmatmul.mubr.f32.gmra.mrb[2].mxu0 %v6045_v59  ;;  %1104 = vmatmul.mubr.f32.gmra.mrb[2].mxu1 %v6045_v59  ;;  %v7123_v59 = vand.u32 4294901760, %v5833_v26  ;;  %v5044_v26 = vpack.c.bf16 %v7130_v45, %v7129_v27  ;;  %v1458_v27 = vld [vmem:[%s7073_s6 + $0x78] sm:$0xff]  ;;  %v1459_v45 = vld [vmem:[%s7073_s6 + $0x80] sm:$0xff] }
  0x66   :  { %4963 = vmatpush1.bf16.msra.mxu0 %v5890_v60  ;;  %5035 = vmatpush1.bf16.msra.mxu1 %v5905_v4  ;;  %v1519_v61 = vand.u32 4294901760, %v1459_v45 }
  0x67   :  { %4965 = vmatprep.subr.bf16.mxu0 %v5909_v6  ;;  %5037 = vmatprep.subr.bf16.mxu1 %v5916_v9  ;;  %v4970_v15 = vpack.c.bf16 %v7124_v17, %v7123_v59 }
  0x68   :  { %518 = vmatprep.mubr.f32.mxu0 %v7097_v0  ;;  %1186 = vmatprep.mubr.f32.mxu1 %v7097_v0 }
  0x6a   :  { %4967 = vmatpush1.bf16.msra.mxu0 %v5932_v30  ;;  %5039 = vmatpush1.bf16.msra.mxu1 %v5938_v33 }
  0x6b   :  { %4969 = vmatprep.subr.bf16.mxu0 %v4968_v1  ;;  %5041 = vmatprep.subr.bf16.mxu1 %v5040_v63  ;;  %v1507_v1 = vand.u32 4294901760, %v1455_v36  ;;  %v1510_v63 = vand.u32 4294901760, %v1456_v52 }
  0x6d   :  { %522 = vmatmul.mubr.f32.vlgmr.msra.gmra.mrb[0].mxu0 %v5979_v29  ;;  %1190 = vmatmul.mubr.f32.vlgmr.msra.gmra.mrb[0].mxu1 %v5979_v29  ;;  %v7137_v29 = vand.u32 4294901760, %v5920_v11  ;;  %v1447_v11 = vld [vmem:[%s7073_s6 + $0x20] sm:$0xff]  ;;  %v6311_v49 = vpack.c.bf16 %v1510_v63, %v1507_v1  ;;  %v6313_v51 = vsub.f32 %v1455_v36, %v1507_v1 }
  0x6e   :  { %4971 = vmatpush1.bf16.msra.mxu0 %v4970_v15  ;;  %5043 = vmatpush1.bf16.msra.mxu1 %v5042_v20  ;;  %v1483_v31 = vand.u32 4294901760, %v1447_v11 }
  0x6f   :  { %4973 = vmatprep.subr.bf16.mxu0 %v4972_v22  ;;  %5045 = vmatprep.subr.bf16.mxu1 %v5044_v26  ;;  %v5048_v53 = vpack.c.bf16 %v7137_v29, %v916_v57  ;;  %v1492_v57 = vand.u32 4294901760, %v1450_v35  ;;  %v6294_v26 = vsub.f32 %v1451_v56, %v1495_v37  ;;  %v1513_v29 = vand.u32 4294901760, %v1457_v19 }
  0x70   :  { %527 = vmatprep.mubr.f32.mxu0 %v7097_v0  ;;  %1195 = vmatprep.mubr.f32.mxu1 %v7097_v0  ;;  %v6280_v20 = vsub.f32 %v1447_v11, %v1483_v31 }
  0x71   :  { %531 = vmatmul.mubr.f32.gmra.mrb[2].mxu0 %v6058_v13  ;;  %1199 = vmatmul.mubr.f32.gmra.mrb[2].mxu1 %v6058_v13  ;;  %v1452_v13 = vld [vmem:[%s7073_s6 + $0x48] sm:$0xff]  ;;  %v6286_v22 = vsub.f32 %v1450_v35, %v1492_v57  ;;  %v6318_v62 = vsub.f32 %v1457_v19, %v1513_v29 }
  0x72   :  { %4975 = vmatpush1.bf16.msra.mxu0 %v4974_v41  ;;  %5047 = vmatpush1.bf16.msra.mxu1 %v5046_v2  ;;  %v1498_v44 = vand.u32 4294901760, %v1452_v13  ;;  %v6300_v41 = vsub.f32 %v1454_v50, %v1504_v43  ;;  %v1462_v2 = vld [vmem:[%s7073_s6 + $0x98] sm:$0xff]  ;;  %v7114_v50 = vand.u32 4294901760, %v6280_v20 }
  0x73   :  { %4977 = vmatprep.subr.bf16.mxu0 %v4976_v14  ;;  %5049 = vmatprep.subr.bf16.mxu1 %v5048_v53  ;;  %v6315_v14 = vsub.f32 %v1456_v52, %v1510_v63  ;;  %v1516_v53 = vand.u32 4294901760, %v1458_v27 }
  0x74   :  { %637 = vmatprep.mubr.f32.mxu0 %v7097_v0  ;;  %1305 = vmatprep.mubr.f32.mxu1 %v7097_v0  ;;  %v6249_v3 = vpack.c.bf16 %v1498_v44, %v1495_v37  ;;  %v6296_v28 = vsub.f32 %v1452_v13, %v1498_v44  ;;  %v1617_v36 = vsub.f32 %v6280_v20, %v7114_v50 }
  0x76   :  { %4979 = vmatpush1.bf16.msra.mxu0 %v4978_v5  ;;  %5051 = vmatpush1.bf16.msra.mxu1 %v5050_v8  ;;  %v1522_v5 = vand.u32 4294901760, %v1460_v42  ;;  %v1528_v8 = vand.u32 4294901760, %v1462_v2  ;;  %v1618_v1 = vand.u32 4294901760, %v1617_v36 }
  0x77   :  { %4981 = vmatprep.subr.bf16.mxu0 %v5810_v16  ;;  %5053 = vmatprep.subr.bf16.mxu1 %v5827_v23  ;;  %v1443_v16 = vld [vmem:[%s7073_s6] sm:$0xff]  ;;  %v1444_v23 = vld [vmem:[%s7073_s6 + $0x8] sm:$0xff] }
  0x79   :  { %639 = vmatmul.mubr.f32.vlgmr.msra.gmra.mrb[0].mxu0 %v5960_v54  ;;  %1307 = vmatmul.mubr.f32.vlgmr.msra.gmra.mrb[0].mxu1 %v5960_v54 }
  0x7a   :  { %4983 = vmatpush1.bf16.msra.mxu0 %v5831_v25  ;;  %5055 = vmatpush1.bf16.msra.mxu1 %v5852_v39  ;;  %v1471_v25 = vand.u32 4294901760, %v1443_v16  ;;  %v1474_v39 = vand.u32 4294901760, %v1444_v23 }
  0x7b   :  { %4985 = vmatprep.subr.bf16.mxu0 %v5869_v46  ;;  %5057 = vmatprep.subr.bf16.mxu1 %v5873_v48  ;;  %v7119_v48 = vmov 0.0|0.0  }
  0x7c   :  { %644 = vmatprep.mubr.f32.mxu0 %v7097_v0  ;;  %1312 = vmatprep.mubr.f32.mxu1 %v7097_v0  ;;  %v6208_v46 = vpack.c.bf16 %v1474_v39, %v1471_v25  ;;  %v6268_v59 = vsub.f32 %v1443_v16, %v1471_v25  ;;  %v6270_v17 = vsub.f32 %v1444_v23, %v1474_v39 }
  0x7d   :  { %646 = vmatmul.mubr.f32.gmra.mrb[2].mxu0 %v6039_v55  ;;  %1314 = vmatmul.mubr.f32.gmra.mrb[2].mxu1 %v6039_v55  ;;  %v6321_v16 = vpack.c.bf16 %v1516_v53, %v1513_v29  ;;  %v6323_v23 = vsub.f32 %v1458_v27, %v1516_v53  ;;  %v6325_v25 = vsub.f32 %v1459_v45, %v1519_v61  ;;  %v7111_v27 = vand.u32 4294901760, %v6286_v22 }
  0x7e   :  { %4987 = vmatpush1.bf16.msra.mxu0 %v5890_v60  ;;  %5059 = vmatpush1.bf16.msra.mxu1 %v5905_v4  ;;  %v1445_v60 = vld [vmem:[%s7073_s6 + $0x10] sm:$0xff]  ;;  %v1446_v4 = vld [vmem:[%s7073_s6 + $0x18] sm:$0xff]  ;;  %v6327_v39 = vsub.f32 %v1460_v42, %v1522_v5  ;;  %v7117_v11 = vand.u32 4294901760, %v6270_v17  ;;  %v7110_v53 = vand.u32 4294901760, %v6294_v26 }
  0x7f   :  { %4989 = vmatprep.subr.bf16.mxu0 %v5909_v6  ;;  %5061 = vmatprep.subr.bf16.mxu1 %v5916_v9  ;;  %v1477_v6 = vand.u32 4294901760, %v1445_v60  ;;  %v1480_v9 = vand.u32 4294901760, %v1446_v4 }
  0x80   :  { %728 = vmatprep.mubr.f32.mxu0 %v7097_v0  ;;  %1396 = vmatprep.mubr.f32.mxu1 %v7097_v0 }
  0x81   :  { %v6219_v10 = vpack.c.bf16 %v1480_v9, %v1477_v6  ;;  %v6272_v15 = vsub.f32 %v1445_v60, %v1477_v6  ;;  %v6274_v18 = vsub.f32 %v1446_v4, %v1480_v9  ;;  %v6329_v60 = vsub.f32 %v1461_v47, %v1525_v7 }
  0x82   :  { %4991 = vmatpush1.bf16.msra.mxu0 %v5932_v30  ;;  %5063 = vmatpush1.bf16.msra.mxu1 %v5938_v33  ;;  %v1448_v30 = vld [vmem:[%s7073_s6 + $0x28] sm:$0xff]  ;;  %v6331_v4 = vsub.f32 %v1462_v2, %v1528_v8  ;;  %v6334_v6 = vpack.c.bf16 %v1522_v5, %v1519_v61  ;;  %v7118_v9 = vand.u32 4294901760, %v6268_v59  ;;  %v1638_v47 = vsub.f32 %v6286_v22, %v7111_v27 }
  0x83   :  { %4589 = vmatprep.subr.mxu1 %v7097_v0  ;;  %5064 = vmatprep.subr.bf16.mxu0 %v7119_v48  ;;  %v1486_v32 = vand.u32 4294901760, %v1448_v30  ;;  %v7109_v61 = vand.u32 4294901760, %v6296_v28 }
  0x84   :  { %v1639_v29 = vand.u32 4294901760, %v1638_v47 }
  0x85   :  { %730 = vmatmul.mubr.f32.vlgmr.msra.gmra.mrb[0].mxu0 %v5960_v54  ;;  %1398 = vmatmul.mubr.f32.vlgmr.msra.gmra.mrb[0].mxu1 %v5960_v54  ;;  %v6229_v33 = vpack.c.bf16 %v1486_v32, %v1483_v31  ;;  %v1489_v54 = vand.u32 4294901760, %v1449_v34  ;;  %v6282_v24 = vsub.f32 %v1448_v30, %v1486_v32  ;;  %v6340_v30 = vpack.c.bf16 %v1528_v8, %v1525_v7 }
  0x86   :  { %735 = vmatprep.mubr.f32.mxu0 %v7097_v0  ;;  %1403 = vmatprep.mubr.f32.mxu1 %v7097_v0  ;;  %v1589_v31 = vsub.f32 %v6268_v59, %v7118_v9  ;;  %v1596_v32 = vsub.f32 %v6270_v17, %v7117_v11  ;;  %v1645_v7 = vsub.f32 %v6294_v26, %v7110_v53 }
  0x87   :  { %5066 = vmatpush1.bf16.msra.mxu0 %v6208_v46  ;;  %v6284_v21 = vsub.f32 %v1449_v34, %v1489_v54  ;;  %7141 = vst [vmem:[#allocation8_spill] sm:$0xff] %v6340_v30  ;;  %v7113_v12 = vand.u32 4294901760, %v6282_v24  ;;  %v1652_v8 = vsub.f32 %v6296_v28, %v7109_v61 }
  0x88   :  { %5067 = vmatprep.subr.bf16.mxu0 %v7119_v48  ;;  %v1590_v34 = vand.u32 4294901760, %v1589_v31  ;;  %v1597_v35 = vand.u32 4294901760, %v1596_v32  ;;  %v1646_v31 = vand.u32 4294901760, %v1645_v7  ;;  %v7099_v7 = vand.u32 4294901760, %v6318_v62 }
  0x89   :  { %737 = vmatmul.mubr.f32.gmra.mrb[2].mxu0 %v6039_v55  ;;  %1405 = vmatmul.mubr.f32.gmra.mrb[2].mxu1 %v6039_v55  ;;  %v6239_v55 = vpack.c.bf16 %v1492_v57, %v1489_v54  ;;  %v7116_v54 = vand.u32 4294901760, %v6272_v15  ;;  %v7115_v57 = vand.u32 4294901760, %v6274_v18  ;;  %v1624_v52 = vsub.f32 %v6282_v24, %v7113_v12 }
  0x8a   :  { %v6352_v56 = vpack.c.bf16 %v1597_v35, %v1590_v34  ;;  %v7112_v19 = vand.u32 4294901760, %v6284_v21  ;;  %v1653_v32 = vand.u32 4294901760, %v1652_v8  ;;  %v7108_v34 = vand.u32 4294901760, %v6298_v40 }
  0x8b   :  { %5069 = vmatpush1.bf16.msra.mxu0 %v6219_v10  ;;  %v1603_v13 = vsub.f32 %v6272_v15, %v7116_v54  ;;  %v1610_v37 = vsub.f32 %v6274_v18, %v7115_v57  ;;  %v1625_v63 = vand.u32 4294901760, %v1624_v52  ;;  %v7107_v35 = vand.u32 4294901760, %v6300_v41 }
  0x8c   :  { %5070 = vmatprep.subr.bf16.mxu0 %v7119_v48  ;;  %v1631_v42 = vsub.f32 %v6284_v21, %v7112_v19  ;;  %v7103_v52 = vand.u32 4294901760, %v6313_v51  ;;  %v7100_v8 = vand.u32 4294901760, %v6323_v23 }
  0x8d   :  { %v1604_v44 = vand.u32 4294901760, %v1603_v13  ;;  %v1611_v58 = vand.u32 4294901760, %v1610_v37  ;;  %v6373_v45 = vpack.c.bf16 %v1625_v63, %v1618_v1  ;;  %v6393_v13 = vpack.c.bf16 %v1653_v32, %v1646_v31 }
  0x8e   :  { %v1632_v2 = vand.u32 4294901760, %v1631_v42  ;;  %v1659_v37 = vsub.f32 %v6298_v40, %v7108_v34  ;;  %v7102_v1 = vand.u32 4294901760, %v6315_v14  ;;  %v1673_v42 = vsub.f32 %v6313_v51, %v7103_v52 }
  0x8f   :  { %5072 = vmatpush1.bf16.msra.mxu0 %v6229_v33  ;;  %v6363_v43 = vpack.c.bf16 %v1611_v58, %v1604_v44  ;;  %v1666_v44 = vsub.f32 %v6300_v41, %v7107_v35  ;;  %v1687_v32 = vsub.f32 %v6318_v62, %v7099_v7  ;;  %v755_v35 = vld [vmem:[%s7072_s5] sm:$0x3] }
  0x90   :  { %5073 = vmatprep.subr.bf16.mxu0 %v7119_v48  ;;  %v6383_v5 = vpack.c.bf16 %v1639_v29, %v1632_v2  ;;  %v1660_v58 = vand.u32 4294901760, %v1659_v37  ;;  %v1680_v47 = vsub.f32 %v6315_v14, %v7102_v1  ;;  %v1674_v2 = vand.u32 4294901760, %v1673_v42 }
  0x91   :  { %v1667_v36 = vand.u32 4294901760, %v1666_v44  ;;  %v1694_v37 = vsub.f32 %v6323_v23, %v7100_v8  ;;  %v1688_v44 = vand.u32 4294901760, %v1687_v32  ;;  %v7106_v42 = vand.u32 4294901760, %v6327_v39 }
  0x92   :  { %v1681_v29 = vand.u32 4294901760, %v1680_v47  ;;  %v7104_v8 = vand.u32 4294901760, %v6329_v60  ;;  %v7105_v32 = vand.u32 4294901760, %v6331_v4 }
  0x93   :  { %5075 = vmatpush1.bf16.msra.mxu0 %v6239_v55  ;;  %v6403_v63 = vpack.c.bf16 %v1667_v36, %v1660_v58  ;;  %v1695_v58 = vand.u32 4294901760, %v1694_v37  ;;  %v7101_v36 = vand.u32 4294901760, %v6325_v25 }
  0x94   :  { %5076 = vmatprep.subr.bf16.mxu0 %v7119_v48  ;;  %v6413_v31 = vpack.c.bf16 %v1681_v29, %v1674_v2  ;;  %v1708_v29 = vsub.f32 %v6327_v39, %v7106_v42 }
  0x95   :  { %v6423_v47 = vpack.c.bf16 %v1695_v58, %v1688_v44  ;;  %v1701_v2 = vsub.f32 %v6325_v25, %v7101_v36  ;;  %v1715_v44 = vsub.f32 %v6329_v60, %v7104_v8  ;;  %v1722_v58 = vsub.f32 %v6331_v4, %v7105_v32 }
  0x96   :  { %v1709_v7 = vand.u32 4294901760, %v1708_v29  ;;  %v82_v32 = vlaneseq }
  0x97   :  { %5078 = vmatpush1.bf16.msra.mxu0 %v6249_v3  ;;  %v1702_v0 = vand.u32 4294901760, %v1701_v2  ;;  %v1716_v36 = vand.u32 4294901760, %v1715_v44  ;;  %v1723_v1 = vand.u32 4294901760, %v1722_v58 }
  0x98   :  { %5079 = vmatprep.subr.bf16.mxu0 %v7119_v48 }
  0x99   :  { %v6433_v37 = vpack.c.bf16 %v1709_v7, %v1702_v0  ;;  %v6441_v52 = vpack.c.bf16 %v1723_v1, %v1716_v36  ;;  %v83_v36 = vshrl.u32 %v82_v32, 7 }
  0x9b   :  { %5081 = vmatpush1.bf16.msra.mxu0 %v6259_v38  ;;  %v84_v58 = vsub.s32 0, %v83_v36  ;;  %v88_v34 = vsub.s32 1, %v83_v36 }
  0x9c   :  { %5082 = vmatprep.subr.bf16.mxu0 %v7119_v48 }
  0x9d   :  { %v760_v61 = vrot.slane %v755_v35, %v84_v58  ;;  %v764_v27 = vrot.slane %v755_v35, %v88_v34 }
  0x9f   :  { %5084 = vmatpush1.bf16.msra.mxu0 %v6311_v49 }
  0xa0   :  { %5085 = vmatprep.subr.bf16.mxu0 %v7119_v48 }
  0xa3   :  { %5087 = vmatpush1.bf16.msra.mxu0 %v6321_v16 }
  0xa4   :  { %5088 = vmatprep.subr.bf16.mxu0 %v7119_v48 }
  0xa7   :  { %5090 = vmatpush1.bf16.msra.mxu0 %v6334_v6 }
  0xa8   :  { %5091 = vmatprep.subr.bf16.mxu0 %v7119_v48 }
  0xab   :  { %5093 = vmatpush1.bf16.msra.mxu0 %v6340_v30 }
  0xac   :  { %5094 = vmatprep.subr.bf16.mxu0 %v7119_v48 }
 0x158   :  { %v731_v19 = vpop.f32.mrb[0].mxu0  ;;  %v1399_v12 = vpop.f32.mrb[0].mxu1 }
 0x159   :  { %v5488_v32 = vadd.f32 %v1399_v12, %v760_v61  ;;  %v733_v50 = vpop.f32.mrb[1].mxu0  ;;  %v1401_v57 = vpop.f32.mrb[1].mxu1 }
 0x15a   :  { %v5489_v11 = vadd.f32 %v1401_v57, %v764_v27 }
 0x15b   :  { %v4408_v9 = vmul.f32 -1.442695, %v5488_v32 }
 0x15c   :  { %v4409_v42 = vmul.f32 -1.442695, %v5489_v11  ;;  %v738_v44 = vpop.f32.mrb[2].mxu0  ;;  %v1406_v1 = vpop.f32.mrb[2].mxu1 }
 0x15d   :  { %5602 = vpow2.f32 %v4408_v9  ;;  %v5490_v36 = vadd.f32 %v1406_v1, %v760_v61  ;;  %v740_v8 = vpop.f32.mrb[3].mxu0  ;;  %v1408_v7 = vpop.f32.mrb[3].mxu1  ;;  %v80_v9 = vld [vmem:[%s7070_s3] sm:$0x3] }
 0x15e   :  { %5604 = vpow2.f32 %v4409_v42  ;;  %v5491_v53 = vadd.f32 %v1408_v7, %v764_v27  ;;  %v85_v27 = vrot.slane %v80_v9, %v84_v58 }
 0x15f   :  { %v4410_v35 = vmul.f32 -1.442695, %v5490_v36 }
 0x160   :  { %v4411_v0 = vmul.f32 -1.442695, %v5491_v53  ;;  %v89_v53 = vrot.slane %v80_v9, %v88_v34  ;;  %v5484_v42 = vadd.f32 %v731_v19, %v85_v27 }
 0x161   :  { %5606 = vpow2.f32 %v4410_v35 }
 0x162   :  { %5608 = vpow2.f32 %v4411_v0  ;;  %v5485_v7 = vadd.f32 %v733_v50, %v89_v53  ;;  %v5487_v35 = vadd.f32 %v740_v8, %v89_v53 }
 0x167   :  { %v5603_v12 = vpop.eup %5602 }
 0x168   :  { %v5605_v29 = vpop.eup %5604  ;;  %v1423_v2 = vadd.f32 1.0, %v5603_v12 }
 0x169   :  { %v1424_v48 = vadd.f32 1.0, %v5605_v29 }
 0x16a   :  { %5610 = vrcp.f32 %v1423_v2  ;;  %v5486_v2 = vadd.f32 %v738_v44, %v85_v27 }
 0x16b   :  { %v5607_v57 = vpop.eup %5606  ;;  %5612 = vrcp.f32 %v1424_v48 }
 0x16c   :  { %v5609_v11 = vpop.eup %5608  ;;  %v1425_v61 = vadd.f32 1.0, %v5607_v57 }
 0x16d   :  { %v1426_v1 = vadd.f32 1.0, %v5609_v11 }
 0x16e   :  { %5614 = vrcp.f32 %v1425_v61 }
 0x16f   :  { %5616 = vrcp.f32 %v1426_v1 }
 0x174   :  { %v5611_v0 = vpop.eup %5610 }
 0x175   :  { %v5613_v32 = vpop.eup %5612  ;;  %v1435_v36 = vmul.f32 %v5611_v0, %v5484_v42 }
 0x176   :  { %v1436_v29 = vmul.f32 %v5613_v32, %v5485_v7 }
 0x177   :  { %5618 = vtanh.f32 %v1435_v36 }
 0x178   :  { %v5615_v48 = vpop.eup %5614  ;;  %5620 = vtanh.f32 %v1436_v29 }
 0x179   :  { %v5617_v12 = vpop.eup %5616  ;;  %v1437_v54 = vmul.f32 %v5615_v48, %v5486_v2 }
 0x17a   :  { %v1438_v30 = vmul.f32 %v5617_v12, %v5487_v35 }
 0x17b   :  { %5622 = vtanh.f32 %v1437_v54 }
 0x17c   :  { %5624 = vtanh.f32 %v1438_v30 }
 0x181   :  { %v5619_v58 = vpop.eup %5618 }
 0x182   :  { %v5621_v57 = vpop.eup %5620  ;;  %v6469_v34 = vand.u32 4294901760, %v5619_v58 }
 0x183   :  { %v1465_v19 = vsel %vm1463_vm1, %v5621_v57, 0 }
 0x184   :  { %v6471_v50 = vand.u32 4294901760, %v1465_v19  ;;  %v6474_v11 = vsub.f32 %v5619_v58, %v6469_v34  ;;  %v7142_v58 = vmov 0.0|0.0  }
 0x185   :  { %v5623_v44 = vpop.eup %5622 }
 0x186   :  { %v5625_v9 = vpop.eup %5624  ;;  %v6477_v8 = vsub.f32 %v1465_v19, %v6471_v50  ;;  %v1562_v61 = vand.u32 4294901760, %v6474_v11  ;;  %v6480_v54 = vand.u32 4294901760, %v5623_v44  ;;  %v7153_v19 = vld [vmem:[#allocation8_spill] sm:$0xff] }
 0x187   :  { %v1468_v30 = vsel %vm1463_vm1, %v5625_v9, 0  ;;  %v7155_v9 = vand.u32 4294901760, %v6270_v17 }
 0x188   :  { %v1556_v1 = vand.u32 4294901760, %v6477_v8  ;;  %v6483_v27 = vand.u32 4294901760, %v1468_v30  ;;  %v6486_v53 = vsub.f32 %v5623_v44, %v6480_v54  ;;  %v1563_v42 = vsub.f32 %v6474_v11, %v1562_v61 }
 0x189   :  { %v7154_v44 = vand.u32 4294901760, %v6268_v59 }
 0x18a   :  { %v1557_v0 = vsub.f32 %v6477_v8, %v1556_v1  ;;  %v6495_v7 = vsub.f32 %v1468_v30, %v6483_v27  ;;  %v1577_v32 = vand.u32 4294901760, %v6486_v53  ;;  %v1564_v2 = vand.u32 4294901760, %v1563_v42 }
 0x18b   :  { %v7156_v30 = vand.u32 4294901760, %v6272_v15 }
 0x18c   :  { %v1558_v36 = vand.u32 4294901760, %v1557_v0  ;;  %v1571_v29 = vand.u32 4294901760, %v6495_v7  ;;  %v1578_v48 = vsub.f32 %v6486_v53, %v1577_v32  ;;  %v7163_v0 = vand.u32 4294901760, %v6296_v28 }
 0x18e   :  { %1559 = vmatprep.mubr.f32.mxu0 %v1558_v36  ;;  %v1572_v35 = vsub.f32 %v6495_v7, %v1571_v29  ;;  %v1579_v57 = vand.u32 4294901760, %v1578_v48 }
 0x18f   :  { %1565 = vmatmul.mubr.f32.vlgmr.msra.gmra.mrb[4].mxu0 %v1564_v2 }
 0x190   :  { %5096 = vmatpush1.bf16.msra.mxu0 %v6352_v56  ;;  %v1573_v12 = vand.u32 4294901760, %v1572_v35  ;;  %v7143_v56 = vpack.c.bf16 %v6270_v17, %v6268_v59  ;;  %v7158_v59 = vand.u32 4294901760, %v6280_v20  ;;  %v7159_v17 = vand.u32 4294901760, %v6282_v24 }
 0x191   :  { %5097 = vmatprep.subr.bf16.mxu0 %v7142_v58 }
 0x192   :  { %1574 = vmatprep.mubr.f32.mxu0 %v1573_v12 }
 0x193   :  { %1580 = vmatmul.mubr.f32.gmra.mrb[6].mxu0 %v1579_v57  ;;  %v3131_v57 = vld [vmem:[#allocation2] sm:$0xff] }
 0x194   :  { %5099 = vmatpush1.bf16.msra.mxu0 %v6363_v43  ;;  %1750 = vmatprep.mubr.f32.mxu0 %v6471_v50  ;;  %v7144_v43 = vpack.c.bf16 %v6274_v18, %v6272_v15  ;;  %v7160_v15 = vand.u32 4294901760, %v6284_v21 }
 0x195   :  { %5100 = vmatprep.subr.bf16.mxu0 %v7142_v58 }
 0x198   :  { %5102 = vmatpush1.bf16.msra.mxu0 %v6373_v45  ;;  %v7145_v45 = vpack.c.bf16 %v6282_v24, %v6280_v20  ;;  %v7164_v20 = vand.u32 4294901760, %v6298_v40  ;;  %v7165_v24 = vand.u32 4294901760, %v6300_v41 }
 0x199   :  { %5103 = vmatprep.subr.bf16.mxu0 %v7142_v58 }
 0x19c   :  { %5105 = vmatpush1.bf16.msra.mxu0 %v6383_v5  ;;  %v7146_v5 = vpack.c.bf16 %v6286_v22, %v6284_v21  ;;  %v7166_v21 = vand.u32 4294901760, %v6313_v51 }
 0x19d   :  { %5106 = vmatprep.subr.bf16.mxu0 %v7142_v58 }
 0x1a0   :  { %5108 = vmatpush1.bf16.msra.mxu0 %v6393_v13  ;;  %v7147_v13 = vpack.c.bf16 %v6296_v28, %v6294_v26  ;;  %v7169_v28 = vand.u32 4294901760, %v6323_v23 }
 0x1a1   :  { %5109 = vmatprep.subr.bf16.mxu0 %v7142_v58 }
 0x1a4   :  { %5111 = vmatpush1.bf16.msra.mxu0 %v6403_v63  ;;  %v7149_v63 = vpack.c.bf16 %v6315_v14, %v6313_v51  ;;  %v7172_v51 = vand.u32 4294901760, %v6329_v60 }
 0x1a5   :  { %5112 = vmatprep.subr.bf16.mxu0 %v7142_v58 }
 0x1a8   :  { %5114 = vmatpush1.bf16.msra.mxu0 %v6413_v31  ;;  %v7150_v31 = vpack.c.bf16 %v6323_v23, %v6318_v62 }
 0x1a9   :  { %5115 = vmatprep.subr.bf16.mxu0 %v7142_v58 }
 0x1ac   :  { %5117 = vmatpush1.bf16.msra.mxu0 %v6423_v47  ;;  %v7151_v47 = vpack.c.bf16 %v6327_v39, %v6325_v25 }
 0x1ad   :  { %5118 = vmatprep.subr.bf16.mxu0 %v7142_v58 }
 0x1b0   :  { %5120 = vmatpush1.bf16.msra.mxu0 %v6433_v37  ;;  %v7152_v37 = vpack.c.bf16 %v6331_v4, %v6329_v60 }
 0x1b1   :  { %5121 = vmatprep.subr.bf16.mxu0 %v7142_v58 }
 0x1b4   :  { %5123 = vmatpush1.bf16.msra.mxu0 %v6441_v52  ;;  %v7148_v52 = vpack.c.bf16 %v6300_v41, %v6298_v40  ;;  %v7170_v40 = vand.u32 4294901760, %v6325_v25  ;;  %v7171_v41 = vand.u32 4294901760, %v6327_v39 }
 0x1b5   :  { %5124 = vmatprep.subr.bf16.mxu0 %v7142_v58 }
 0x1b6   :  { %v5209_v2 = vpack.c.bf16 %v7171_v41, %v7170_v40 }
 0x1b7   :  { %1752 = vmatmul.mubr.f32.vlgmr.msra.gmra.mrb[4].mxu0 %v6469_v34 }
 0x1b8   :  { %1757 = vmatprep.mubr.f32.mxu0 %v6483_v27  ;;  %5126 = vmatpush1.bf16.msra.mxu0 %v7143_v56  ;;  %v3132_v56 = vld [vmem:[#allocation2 + $0x8] sm:$0xff] }
 0x1b9   :  { %5127 = vmatprep.subr.bf16.mxu0 %v7142_v58 }
 0x1bb   :  { %1759 = vmatmul.mubr.f32.gmra.mrb[6].mxu0 %v6480_v54 }
 0x1bc   :  { %5129 = vmatpush1.bf16.msra.mxu0 %v7144_v43  ;;  %1870 = vmatprep.mubr.f32.mxu0 %v6477_v8  ;;  %v5185_v8 = vpack.c.bf16 %v7155_v9, %v7154_v44  ;;  %v3133_v43 = vld [vmem:[#allocation2 + $0x10] sm:$0xff] }
 0x1bd   :  { %5130 = vmatprep.subr.bf16.mxu0 %v7142_v58 }
 0x1c0   :  { %5132 = vmatpush1.bf16.msra.mxu0 %v7145_v45  ;;  %v3156_v45 = vand.u32 4294901760, %v3131_v57 }
 0x1c1   :  { %5133 = vmatprep.subr.bf16.mxu0 %v7142_v58 }
 0x1c4   :  { %5135 = vmatpush1.bf16.msra.mxu0 %v7146_v5  ;;  %v3159_v5 = vand.u32 4294901760, %v3132_v56 }
 0x1c5   :  { %5136 = vmatprep.subr.bf16.mxu0 %v7142_v58 }
 0x1c8   :  { %5138 = vmatpush1.bf16.msra.mxu0 %v7147_v13  ;;  %v3134_v13 = vld [vmem:[#allocation2 + $0x18] sm:$0xff] }
 0x1c9   :  { %5139 = vmatprep.subr.bf16.mxu0 %v7142_v58 }
 0x1cc   :  { %5141 = vmatpush1.bf16.msra.mxu0 %v7148_v52  ;;  %v3162_v52 = vand.u32 4294901760, %v3133_v43 }
 0x1cd   :  { %5142 = vmatprep.subr.bf16.mxu0 %v7142_v58 }
 0x1d0   :  { %5144 = vmatpush1.bf16.msra.mxu0 %v7149_v63  ;;  %v3165_v63 = vand.u32 4294901760, %v3134_v13 }
 0x1d1   :  { %5145 = vmatprep.subr.bf16.mxu0 %v7142_v58 }
 0x1d2   :  { %v6724_v44 = vpack.c.bf16 %v3165_v63, %v3162_v52  ;;  %v6726_v9 = vsub.f32 %v3134_v13, %v3165_v63 }
 0x1d4   :  { %5147 = vmatpush1.bf16.msra.mxu0 %v7150_v31  ;;  %v6716_v31 = vpack.c.bf16 %v3159_v5, %v3156_v45 }
 0x1d5   :  { %5148 = vmatprep.subr.bf16.mxu0 %v7142_v58 }
 0x1d8   :  { %5150 = vmatpush1.bf16.msra.mxu0 %v7151_v47  ;;  %v6718_v47 = vsub.f32 %v3131_v57, %v3156_v45 }
 0x1d9   :  { %5151 = vmatprep.subr.bf16.mxu0 %v7142_v58 }
 0x1dc   :  { %5153 = vmatpush1.bf16.msra.mxu0 %v7152_v37  ;;  %v6720_v37 = vsub.f32 %v3132_v56, %v3159_v5 }
 0x1dd   :  { %5154 = vmatprep.subr.bf16.mxu0 %v7142_v58 }
 0x1de   :  { %v5284_v5 = vpack.c.bf16 %v6720_v37, %v6718_v47 }
 0x1df   :  { %1873 = vmatmul.mubr.f32.vlgmr.msra.gmra.mrb[4].mxu0 %v6474_v11  ;;  %v5191_v11 = vpack.c.bf16 %v7159_v17, %v7158_v59 }
 0x1e0   :  { %1879 = vmatprep.mubr.f32.mxu0 %v6495_v7  ;;  %5156 = vmatpush1.bf16.msra.mxu0 %v6208_v46 }
 0x1e1   :  { %5157 = vmatprep.subr.bf16.mxu0 %v7142_v58 }
 0x1e3   :  { %1882 = vmatmul.mubr.f32.gmra.mrb[6].mxu0 %v6486_v53  ;;  %v7162_v53 = vand.u32 4294901760, %v6294_v26  ;;  %v7168_v26 = vand.u32 4294901760, %v6318_v62 }
 0x1e4   :  { %5159 = vmatpush1.bf16.msra.mxu0 %v6219_v10  ;;  %1974 = vmatprep.mubr.f32.mxu0 %v1556_v1  ;;  %v7157_v1 = vand.u32 4294901760, %v6274_v18  ;;  %v7161_v18 = vand.u32 4294901760, %v6286_v22  ;;  %v7167_v22 = vand.u32 4294901760, %v6315_v14  ;;  %v7173_v14 = vand.u32 4294901760, %v6331_v4 }
 0x1e5   :  { %5160 = vmatprep.subr.bf16.mxu0 %v7142_v58  ;;  %v5197_v7 = vpack.c.bf16 %v7163_v0, %v7162_v53  ;;  %v3135_v0 = vld [vmem:[#allocation2 + $0x20] sm:$0xff] }
 0x1e6   :  { %v5188_v42 = vpack.c.bf16 %v7157_v1, %v7156_v30  ;;  %v5203_v36 = vpack.c.bf16 %v7167_v22, %v7166_v21  ;;  %v5212_v48 = vpack.c.bf16 %v7173_v14, %v7172_v51  ;;  %v3260_v30 = vand.u32 4294901760, %v6720_v37 }
 0x1e8   :  { %5162 = vmatpush1.bf16.msra.mxu0 %v6229_v33  ;;  %v3261_v17 = vsub.f32 %v6720_v37, %v3260_v30 }
 0x1e9   :  { %5163 = vmatprep.subr.bf16.mxu0 %v7142_v58 }
 0x1ec   :  { %5165 = vmatpush1.bf16.msra.mxu0 %v6239_v55 }
 0x1ed   :  { %5166 = vmatprep.subr.bf16.mxu0 %v7142_v58 }
 0x1f0   :  { %5168 = vmatpush1.bf16.msra.mxu0 %v6249_v3 }
 0x1f1   :  { %5169 = vmatprep.subr.bf16.mxu0 %v7142_v58 }
 0x1f4   :  { %5171 = vmatpush1.bf16.msra.mxu0 %v6259_v38 }
 0x1f5   :  { %5172 = vmatprep.subr.bf16.mxu0 %v7142_v58 }
 0x1f8   :  { %5174 = vmatpush1.bf16.msra.mxu0 %v6311_v49 }
 0x1f9   :  { %5175 = vmatprep.subr.bf16.mxu0 %v7142_v58 }
 0x1fc   :  { %5177 = vmatpush1.bf16.msra.mxu0 %v6321_v16 }
 0x1fd   :  { %5178 = vmatprep.subr.bf16.mxu0 %v7142_v58 }
 0x200   :  { %5180 = vmatpush1.bf16.msra.mxu0 %v6334_v6 }
 0x201   :  { %5181 = vmatprep.subr.bf16.mxu0 %v7142_v58 }
 0x204   :  { %5183 = vmatpush1.bf16.msra.mxu0 %v7153_v19 }
 0x205   :  { %5184 = vmatprep.subr.bf16.mxu0 %v7142_v58 }
 0x207   :  { %1978 = vmatmul.mubr.f32.vlgmr.msra.gmra.mrb[4].mxu0 %v1562_v61  ;;  %v5194_v61 = vpack.c.bf16 %v7161_v18, %v7160_v15 }
 0x208   :  { %1985 = vmatprep.mubr.f32.mxu0 %v1571_v29  ;;  %5186 = vmatpush1.bf16.msra.mxu0 %v5185_v8  ;;  %v5206_v29 = vpack.c.bf16 %v7169_v28, %v7168_v26  ;;  %v3253_v8 = vand.u32 4294901760, %v6718_v47  ;;  %v3137_v28 = vld [vmem:[#allocation2 + $0x30] sm:$0xff] }
 0x209   :  { %5187 = vmatprep.subr.bf16.mxu0 %v7142_v58 }
 0x20a   :  { %v3254_v59 = vsub.f32 %v6718_v47, %v3253_v8 }
 0x20b   :  { %1989 = vmatmul.mubr.f32.gmra.mrb[6].mxu0 %v1577_v32  ;;  %v5200_v32 = vpack.c.bf16 %v7165_v24, %v7164_v20  ;;  %v3168_v24 = vand.u32 4294901760, %v3135_v0 }
 0x20c   :  { %5189 = vmatpush1.bf16.msra.mxu0 %v5188_v42  ;;  %2119 = vmatprep.mubr.f32.mxu0 %v6471_v50  ;;  %v3274_v42 = vand.u32 4294901760, %v6726_v9  ;;  %v3255_v18 = vand.u32 4294901760, %v3254_v59 }
 0x20d   :  { %5190 = vmatprep.subr.bf16.mxu0 %v7142_v58 }
 0x20e   :  { %v3275_v15 = vsub.f32 %v6726_v9, %v3274_v42 }
 0x210   :  { %5192 = vmatpush1.bf16.msra.mxu0 %v5191_v11  ;;  %v3276_v20 = vand.u32 4294901760, %v3275_v15 }
 0x211   :  { %5193 = vmatprep.subr.bf16.mxu0 %v7142_v58 }
 0x214   :  { %5195 = vmatpush1.bf16.msra.mxu0 %v5194_v61  ;;  %v3262_v61 = vand.u32 4294901760, %v3261_v17 }
 0x215   :  { %5196 = vmatprep.subr.bf16.mxu0 %v7142_v58 }
 0x216   :  { %v5264_v21 = vpack.c.bf16 %v3262_v61, %v3255_v18 }
 0x218   :  { %5198 = vmatpush1.bf16.msra.mxu0 %v5197_v7  ;;  %v3136_v7 = vld [vmem:[#allocation2 + $0x28] sm:$0xff] }
 0x219   :  { %5199 = vmatprep.subr.bf16.mxu0 %v7142_v58 }
 0x21c   :  { %5201 = vmatpush1.bf16.msra.mxu0 %v5200_v32  ;;  %v3171_v32 = vand.u32 4294901760, %v3136_v7 }
 0x21d   :  { %5202 = vmatprep.subr.bf16.mxu0 %v7142_v58 }
 0x21e   :  { %v3287_v26 = vsub.f32 %v3136_v7, %v3171_v32 }
 0x220   :  { %5204 = vmatpush1.bf16.msra.mxu0 %v5203_v36  ;;  %v6748_v36 = vsub.f32 %v3135_v0, %v3168_v24  ;;  %v3288_v41 = vand.u32 4294901760, %v3287_v26 }
 0x221   :  { %5205 = vmatprep.subr.bf16.mxu0 %v7142_v58 }
 0x222   :  { %v3281_v40 = vand.u32 4294901760, %v6748_v36  ;;  %v5292_v59 = vpack.c.bf16 %v3287_v26, %v6748_v36 }
 0x224   :  { %5207 = vmatpush1.bf16.msra.mxu0 %v5206_v29  ;;  %v3138_v29 = vld [vmem:[#allocation2 + $0x38] sm:$0xff]  ;;  %v3282_v14 = vsub.f32 %v6748_v36, %v3281_v40  ;;  %v6769_v61 = vpack.c.bf16 %v3288_v41, %v3281_v40 }
 0x225   :  { %5208 = vmatprep.subr.bf16.mxu0 %v7142_v58  ;;  %v3177_v51 = vand.u32 4294901760, %v3138_v29 }
 0x228   :  { %5210 = vmatpush1.bf16.msra.mxu0 %v5209_v2  ;;  %v3174_v2 = vand.u32 4294901760, %v3137_v28 }
 0x229   :  { %5211 = vmatprep.subr.bf16.mxu0 %v7142_v58 }
 0x22a   :  { %v6758_v13 = vpack.c.bf16 %v3177_v51, %v3174_v2 }
 0x22c   :  { %5213 = vmatpush1.bf16.msra.mxu0 %v5212_v48  ;;  %v3289_v48 = vsub.f32 %v3287_v26, %v3288_v41 }
 0x22d   :  { %5214 = vmatprep.subr.bf16.mxu0 %v7142_v58 }
 0x22f   :  { %2121 = vmatmul.mubr.f32.vlgmr.msra.gmra.mrb[4].mxu0 %v6469_v34 }
 0x230   :  { %2126 = vmatprep.mubr.f32.mxu0 %v6483_v27  ;;  %5216 = vmatpush1.bf16.msra.mxu0 %v6208_v46  ;;  %v7174_v46 = vmov 0.0  }
 0x231   :  { %5217 = vmatprep.subr.bf16.mxu0 %v7142_v58  ;;  %4591 = vmatprep.mubr.msk.f32.mxu1 %vm5696_vm2, %v7174_v46 }
 0x233   :  { %2128 = vmatmul.mubr.f32.gmra.mrb[6].mxu0 %v6480_v54 }
 0x234   :  { %5219 = vmatpush1.bf16.msra.mxu0 %v6219_v10  ;;  %2218 = vmatprep.mubr.f32.mxu0 %v6471_v50  ;;  %v2232_v10 = vld [vmem:[%s7068_s1] sm:$0xff] }
 0x235   :  { %5220 = vmatprep.subr.bf16.mxu0 %v7142_v58 }
 0x238   :  { %5222 = vmatpush1.bf16.msra.mxu0 %v6229_v33  ;;  %v2235_v33 = vsel %vm2233_vm3, %v2232_v10, 0  ;;  %v3301_v10 = vsub.f32 %v3138_v29, %v3177_v51 }
 0x239   :  { %5223 = vmatprep.subr.bf16.mxu0 %v7142_v58 }
 0x23c   :  { %5225 = vmatpush1.bf16.msra.mxu0 %v6239_v55  ;;  %v2303_v55 = vand.u32 4294901760, %v2235_v33 }
 0x23d   :  { %5226 = vmatprep.subr.bf16.mxu0 %v7142_v58 }
 0x240   :  { %5228 = vmatpush1.bf16.msra.mxu0 %v6249_v3  ;;  %v2304_v3 = vsub.f32 %v2235_v33, %v2303_v55  ;;  %v3139_v33 = vld [vmem:[#allocation2 + $0x40] sm:$0xff] }
 0x241   :  { %5229 = vmatprep.subr.bf16.mxu0 %v7142_v58 }
 0x244   :  { %5231 = vmatpush1.bf16.msra.mxu0 %v6259_v38  ;;  %v2305_v38 = vand.u32 4294901760, %v2304_v3 }
 0x245   :  { %5232 = vmatprep.subr.bf16.mxu0 %v7142_v58 }
 0x248   :  { %5234 = vmatpush1.bf16.msra.mxu0 %v6311_v49  ;;  %v2306_v49 = vsub.f32 %v2304_v3, %v2305_v38 }
 0x249   :  { %5235 = vmatprep.subr.bf16.mxu0 %v7142_v58 }
 0x24c   :  { %5237 = vmatpush1.bf16.msra.mxu0 %v6321_v16  ;;  %v2307_v16 = vand.u32 4294901760, %v2306_v49 }
 0x24d   :  { %5238 = vmatprep.subr.bf16.mxu0 %v7142_v58 }
 0x250   :  { %5240 = vmatpush1.bf16.msra.mxu0 %v6334_v6 }
 0x251   :  { %5241 = vmatprep.subr.bf16.mxu0 %v7142_v58 }
 0x254   :  { %5243 = vmatpush1.bf16.msra.mxu0 %v7153_v19  ;;  %v6722_v19 = vsub.f32 %v3133_v43, %v3162_v52  ;;  %v6752_v43 = vpack.c.bf16 %v3171_v32, %v3168_v24 }
 0x255   :  { %4584 = vmatprep.subr.mxu0 %v7174_v46 }
 0x256   :  { %v3267_v1 = vand.u32 4294901760, %v6722_v19  ;;  %v5288_v63 = vpack.c.bf16 %v6726_v9, %v6722_v19 }
 0x257   :  { %2220 = vmatmul.mubr.f32.vlgmr.msra.gmra.mrb[4].mxu0 %v6469_v34 }
 0x258   :  { %2225 = vmatprep.mubr.f32.mxu0 %v6483_v27  ;;  %v3268_v11 = vsub.f32 %v6722_v19, %v3267_v1  ;;  %v5328_v37 = vpack.c.bf16 %v3274_v42, %v3267_v1 }
 0x25a   :  { %v3269_v53 = vand.u32 4294901760, %v3268_v11 }
 0x25b   :  { %2227 = vmatmul.mubr.f32.gmra.mrb[6].mxu0 %v6480_v54 }
 0x25c   :  { %4586 = vmatprep.mubr.msk.f32.mxu0 %vm5696_vm2, %v7174_v46  ;;  %v5268_v22 = vpack.c.bf16 %v3276_v20, %v3269_v53 }
 0x32a   :  { %v2221_v62 = vpop.f32.mrb[4].mxu0 }
 0x32b   :  { %v2238_v23 = vand.u32 4294901760, %v2221_v62  ;;  %v2223_v25 = vpop.f32.mrb[5].mxu0 }
 0x32d   :  { %v2315_v39 = vsub.f32 %v2221_v62, %v2238_v23  ;;  %4585 = vmatpush3.msra.mxu0 %v2238_v23  ;;  %v3302_v62 = vand.u32 4294901760, %v3301_v10 }
 0x32e   :  { %v2228_v60 = vpop.f32.mrb[6].mxu0  ;;  %4587 = vmatmul.mubr.f32.vlgmr.msra.gmra.mrb[8].mxu0 %v2307_v16  ;;  %5245 = vmatprep.subr.bf16.mxu0 %v6716_v31 }
 0x32f   :  { %v2316_v4 = vand.u32 4294901760, %v2315_v39  ;;  %v2230_v6 = vpop.f32.mrb[7].mxu0  ;;  %v2684_v54 = vand.u32 4294901760, %v2228_v60  ;;  %5247 = vmatpush3.bf16.msra.mxu0 %v6716_v31 }
 0x330   :  { %5249 = vmatprep.subr.bf16.mxu0 %v6724_v44 }
 0x331   :  { %v2317_v34 = vsub.f32 %v2315_v39, %v2316_v4  ;;  %v2761_v27 = vsub.f32 %v2228_v60, %v2684_v54  ;;  %v3303_v60 = vsub.f32 %v3301_v10, %v3302_v62 }
 0x333   :  { %v2318_v50 = vand.u32 4294901760, %v2317_v34  ;;  %v2762_v35 = vand.u32 4294901760, %v2761_v27  ;;  %5251 = vmatpush3.bf16.msra.mxu0 %v6724_v44 }
 0x334   :  { %5253 = vmatprep.subr.bf16.mxu0 %v6752_v43 }
 0x335   :  { %4590 = vmatpush3.msra.mxu1 %v2318_v50  ;;  %v2763_v12 = vsub.f32 %v2761_v27, %v2762_v35  ;;  %v3304_v50 = vand.u32 4294901760, %v3303_v60 }
 0x336   :  { %4592 = vmatmul.mubr.f32.vlgmr.msra.gmra.mrb[4].mxu1 %v2303_v55  ;;  %4594 = vmatprep.subr.mxu1 %v7174_v46 }
 0x337   :  { %4595 = vmatpush3.msra.mxu1 %v2315_v39  ;;  %4596 = vmatprep.mubr.msk.f32.mxu1 %vm5696_vm2, %v7174_v46  ;;  %v2764_v58 = vand.u32 4294901760, %v2763_v12 }
 0x338   :  { %4599 = vmatprep.subr.mxu1 %v7174_v46  ;;  %5255 = vmatpush3.bf16.msra.mxu0 %v6752_v43 }
 0x339   :  { %5257 = vmatprep.subr.bf16.mxu0 %v6758_v13 }
 0x33c   :  { %5259 = vmatpush3.bf16.msra.mxu0 %v6758_v13 }
 0x33e   :  { %4597 = vmatmul.mubr.f32.vlgmr.msra.gmra.mrb[4].mxu1 %v2304_v3 }
 0x33f   :  { %4600 = vmatpush3.msra.mxu1 %v2238_v23  ;;  %4601 = vmatprep.mubr.msk.f32.mxu1 %vm5696_vm2, %v7174_v46 }
 0x340   :  { %4604 = vmatprep.subr.mxu1 %v7174_v46 }
 0x346   :  { %4602 = vmatmul.mubr.f32.vlgmr.msra.gmra.mrb[4].mxu1 %v2305_v38 }
 0x347   :  { %4605 = vmatpush3.msra.mxu1 %v2316_v4  ;;  %4606 = vmatprep.mubr.msk.f32.mxu1 %vm5696_vm2, %v7174_v46 }
 0x348   :  { %4609 = vmatprep.subr.mxu1 %v7174_v46 }
 0x34e   :  { %4607 = vmatmul.mubr.f32.vlgmr.msra.gmra.mrb[4].mxu1 %v2303_v55 }
 0x34f   :  { %4610 = vmatpush3.msra.mxu1 %v2238_v23  ;;  %4611 = vmatprep.mubr.msk.f32.mxu1 %vm5696_vm2, %v7174_v46 }
 0x350   :  { %4614 = vmatprep.subr.mxu1 %v7174_v46 }
 0x356   :  { %4612 = vmatmul.mubr.f32.vlgmr.msra.gmra.mrb[4].mxu1 %v2303_v55 }
 0x357   :  { %4615 = vmatpush3.msra.mxu1 %v2684_v54  ;;  %4616 = vmatprep.mubr.msk.f32.mxu1 %vm5696_vm2, %v7174_v46 }
 0x358   :  { %4619 = vmatprep.subr.mxu1 %v7174_v46 }
 0x35a   :  { %4617 = vmatmul.mubr.f32.vlgmr.msra.gmra.mrb[6].mxu1 %v2307_v16  ;;  %v3180_v16 = vand.u32 4294901760, %v3139_v33 }
 0x35b   :  { %4620 = vmatpush3.msra.mxu1 %v2764_v58  ;;  %4621 = vmatprep.mubr.msk.f32.mxu1 %vm5696_vm2, %v7174_v46 }
 0x35c   :  { %4624 = vmatprep.subr.mxu1 %v7174_v46  ;;  %v3308_v4 = vsub.f32 %v3139_v33, %v3180_v16 }
 0x362   :  { %4622 = vmatmul.mubr.f32.vlgmr.msra.gmra.mrb[6].mxu1 %v2303_v55 }
 0x363   :  { %4625 = vmatpush3.msra.mxu1 %v2761_v27  ;;  %4626 = vmatprep.mubr.msk.f32.mxu1 %vm5696_vm2, %v7174_v46 }
 0x364   :  { %4629 = vmatprep.subr.mxu1 %v7174_v46 }
 0x36a   :  { %4627 = vmatmul.mubr.f32.vlgmr.msra.gmra.mrb[6].mxu1 %v2304_v3  ;;  %v3283_v3 = vand.u32 4294901760, %v3282_v14 }
 0x36b   :  { %4630 = vmatpush3.msra.mxu1 %v2684_v54  ;;  %4631 = vmatprep.mubr.msk.f32.mxu1 %vm5696_vm2, %v7174_v46 }
 0x36c   :  { %4634 = vmatprep.subr.mxu1 %v7174_v46 }
 0x372   :  { %4632 = vmatmul.mubr.f32.vlgmr.msra.gmra.mrb[6].mxu1 %v2305_v38  ;;  %v3290_v38 = vand.u32 4294901760, %v3289_v48 }
 0x373   :  { %4635 = vmatpush3.msra.mxu1 %v2762_v35  ;;  %4636 = vmatprep.mubr.msk.f32.mxu1 %vm5696_vm2, %v7174_v46 }
 0x374   :  { %4639 = vmatprep.subr.mxu1 %v7174_v46  ;;  %v5272_v25 = vpack.c.bf16 %v3290_v38, %v3283_v3  ;;  %v6807_v3 = vld [vmem:[#allocation4 + $0x8] sm:$0xff] }
 0x37a   :  { %4637 = vmatmul.mubr.f32.vlgmr.msra.gmra.mrb[6].mxu1 %v2303_v55 }
 0x37b   :  { %4640 = vmatpush3.msra.mxu1 %v2684_v54  ;;  %4641 = vmatprep.mubr.msk.f32.mxu1 %vm5696_vm2, %v7174_v46  ;;  %v3294_v46 = vsub.f32 %v3137_v28, %v3174_v2  ;;  %v3309_v54 = vand.u32 4294901760, %v3308_v4 }
 0x37c   :  { %5265 = vmatprep.subr.bf16.mxu1 %v5264_v21 }
 0x37d   :  { %v3295_v49 = vand.u32 4294901760, %v3294_v46  ;;  %v3310_v12 = vsub.f32 %v3308_v4, %v3309_v54  ;;  %v5296_v17 = vpack.c.bf16 %v3301_v10, %v3294_v46 }
 0x37f   :  { %v3296_v39 = vsub.f32 %v3294_v46, %v3295_v49  ;;  %v3311_v57 = vand.u32 4294901760, %v3310_v12  ;;  %v6771_v53 = vpack.c.bf16 %v3302_v62, %v3295_v49  ;;  %v3782_v49 = vand.u32 4294901760, %v6807_v3  ;;  %v6815_v62 = vld [vmem:[#allocation4 + $0x10] sm:$0xff] }
 0x381   :  { %v3297_v34 = vand.u32 4294901760, %v3296_v39  ;;  %v3785_v39 = vand.u32 4294901760, %v6815_v62 }
 0x382   :  { %4642 = vmatmul.mubr.f32.vlgmr.msra.gmra.mrb[6].mxu1 %v2303_v55  ;;  %v3140_v55 = vld [vmem:[#allocation2 + $0x48] sm:$0xff] }
 0x383   :  { %5267 = vmatpush3.bf16.msra.mxu1 %v5264_v21  ;;  %v3183_v23 = vand.u32 4294901760, %v3140_v55  ;;  %v5276_v35 = vpack.c.bf16 %v3304_v50, %v3297_v34  ;;  %v6840_v34 = vsub.f32 %v6815_v62, %v3785_v39 }
 0x384   :  { %5269 = vmatprep.subr.bf16.mxu1 %v5268_v22 }
 0x385   :  { %v3315_v6 = vsub.f32 %v3140_v55, %v3183_v23  ;;  %v6760_v52 = vpack.c.bf16 %v3183_v23, %v3180_v16  ;;  %v6805_v55 = vld [vmem:[#allocation4] sm:$0xff]  ;;  %v6817_v16 = vld [vmem:[#allocation4 + $0x18] sm:$0xff] }
 0x386   :  { %v3779_v38 = vand.u32 4294901760, %v6805_v55  ;;  %v3788_v60 = vand.u32 4294901760, %v6817_v16 }
 0x387   :  { %5271 = vmatpush3.bf16.msra.mxu1 %v5268_v22  ;;  %v3316_v27 = vand.u32 4294901760, %v3315_v6  ;;  %5261 = vmatprep.subr.bf16.mxu0 %v6760_v52  ;;  %v5300_v11 = vpack.c.bf16 %v3315_v6, %v3308_v4  ;;  %v6833_v4 = vld [vmem:[#allocation4 + $0x20] sm:$0xff] }
 0x388   :  { %5273 = vmatprep.subr.bf16.mxu1 %v5272_v25  ;;  %5263 = vmatpush3.bf16.msra.mxu0 %v6760_v52  ;;  %v6822_v23 = vsub.f32 %v6805_v55, %v3779_v38  ;;  %v6845_v50 = vsub.f32 %v6817_v16, %v3788_v60 }
 0x389   :  { %v3317_v58 = vsub.f32 %v3315_v6, %v3316_v27  ;;  %v6773_v0 = vpack.c.bf16 %v3316_v27, %v3309_v54  ;;  %v6835_v6 = vld [vmem:[#allocation4 + $0x28] sm:$0xff] }
 0x38a   :  { %v3876_v54 = vand.u32 4294901760, %v6822_v23  ;;  %v3794_v12 = vand.u32 4294901760, %v6835_v6 }
 0x38b   :  { %5275 = vmatpush3.bf16.msra.mxu1 %v5272_v25  ;;  %v3318_v56 = vand.u32 4294901760, %v3317_v58  ;;  %v6827_v25 = vsub.f32 %v6807_v3, %v3782_v49  ;;  %v6853_v58 = vld [vmem:[#allocation4 + $0x30] sm:$0xff] }
 0x38c   :  { %5277 = vmatprep.subr.bf16.mxu1 %v5276_v35 }
 0x38d   :  { %v5280_v45 = vpack.c.bf16 %v3318_v56, %v3311_v57  ;;  %v3883_v27 = vand.u32 4294901760, %v6827_v25  ;;  %v6855_v57 = vld [vmem:[#allocation4 + $0x38] sm:$0xff] }
 0x38f   :  { %5279 = vmatpush3.bf16.msra.mxu1 %v5276_v35  ;;  %v3791_v35 = vand.u32 4294901760, %v6833_v4  ;;  %v6861_v56 = vpack.c.bf16 %v3883_v27, %v3876_v54 }
 0x390   :  { %5281 = vmatprep.subr.bf16.mxu1 %v5280_v45 }
 0x393   :  { %5283 = vmatpush3.bf16.msra.mxu1 %v5280_v45  ;;  %v3890_v45 = vand.u32 4294901760, %v6840_v34 }
 0x394   :  { %5285 = vmatprep.subr.bf16.mxu1 %v5284_v5 }
 0x401   :  { %v2309_v15 = vpop.f32.mrb[8].mxu0 }
 0x402   :  { %v4588_v18 = vpop.f32.mrb[9].mxu0 }
 0x403   :  { %v5324_v18 = vpack.c.bf16 %v3260_v30, %v3253_v8 }
 0x429   :  { %v2679_v7 = vpop.f32.mrb[4].mxu1 }
 0x42a   :  { %v5492_v20 = vadd.f32 %v2679_v7, %v2309_v15  ;;  %v4613_v24 = vpop.f32.mrb[5].mxu1  ;;  %v3769_v7 = vld [vmem:[#allocation4 + $0x40] sm:$0xff] }
 0x42c   :  { %5626 = vtanh.f32 %v5492_v20  ;;  %v3770_v20 = vld [vmem:[#allocation4 + $0x48] sm:$0xff] }
 0x436   :  { %v5627_v32 = vpop.eup %5626 }
 0x437   :  { %v3150_v21 = vsel %vm3148_vm4, %v5627_v32, 0 }
 0x438   :  { %v6775_v22 = vand.u32 4294901760, %v3150_v21 }
 0x43a   :  { %4687 = vmatprep.mubr.f32.mxu1 %v6775_v22  ;;  %v6779_v36 = vsub.f32 %v3150_v21, %v6775_v22 }
 0x43c   :  { %v6782_v26 = vand.u32 4294901760, %v6779_v36 }
 0x43e   :  { %v3233_v28 = vsub.f32 %v6779_v36, %v6782_v26 }
 0x440   :  { %v6786_v29 = vand.u32 4294901760, %v3233_v28 }
 0x442   :  { %4664 = vmatprep.mubr.f32.mxu0 %v6786_v29 }
 0x455   :  { %v3125_v40 = vpop.f32.mrb[6].mxu1 }
 0x456   :  { %5628 = vtanh.f32 %v3125_v40  ;;  %v4643_v41 = vpop.f32.mrb[7].mxu1  ;;  %v3803_v40 = vand.u32 4294901760, %v3769_v7 }
 0x457   :  { %v3806_v41 = vand.u32 4294901760, %v3770_v20 }
 0x460   :  { %v5629_v2 = vpop.eup %5628 }
 0x461   :  { %v3153_v51 = vsel %vm3148_vm4, %v5629_v2, 0  ;;  %v6906_v2 = vsub.f32 %v3769_v7, %v3803_v40 }
 0x462   :  { %v6789_v14 = vand.u32 4294901760, %v3153_v51 }
 0x463   :  { %v3932_v9 = vand.u32 4294901760, %v6906_v2 }
 0x464   :  { %v6792_v48 = vsub.f32 %v3153_v51, %v6789_v14  ;;  %4688 = vmatmul.mubr.f32.vlgmr.msra.gmra.mrb[8].mxu1 %v6789_v14  ;;  %v6908_v51 = vsub.f32 %v3770_v20, %v3806_v41 }
 0x465   :  { %5287 = vmatpush3.bf16.msra.mxu1 %v5284_v5  ;;  %4710 = vmatprep.mubr.f32.mxu1 %v6779_v36  ;;  %v3897_v5 = vand.u32 4294901760, %v6845_v50 }
 0x466   :  { %5289 = vmatprep.subr.bf16.mxu1 %v5288_v63  ;;  %v6797_v46 = vand.u32 4294901760, %v6792_v48  ;;  %v3939_v1 = vand.u32 4294901760, %v6908_v51 }
 0x467   :  { %v6882_v15 = vpack.c.bf16 %v3897_v5, %v3890_v45  ;;  %v3898_v55 = vsub.f32 %v6845_v50, %v3897_v5 }
 0x468   :  { %v3243_v10 = vsub.f32 %v6792_v48, %v6797_v46  ;;  %v6924_v42 = vpack.c.bf16 %v3939_v1, %v3932_v9 }
 0x469   :  { %5291 = vmatpush3.bf16.msra.mxu1 %v5288_v63  ;;  %v6868_v63 = vsub.f32 %v6833_v4, %v3791_v35  ;;  %v3899_v16 = vand.u32 4294901760, %v3898_v55 }
 0x46a   :  { %5293 = vmatprep.subr.bf16.mxu1 %v5292_v59  ;;  %v6801_v33 = vand.u32 4294901760, %v3243_v10  ;;  %v3891_v10 = vsub.f32 %v6840_v34, %v3890_v45 }
 0x46b   :  { %v3904_v24 = vand.u32 4294901760, %v6868_v63 }
 0x46c   :  { %4665 = vmatmul.mubr.f32.vlgmr.msra.gmra.mrb[10].mxu0 %v6801_v33  ;;  %v3892_v62 = vand.u32 4294901760, %v3891_v10 }
 0x46d   :  { %5295 = vmatpush3.bf16.msra.mxu1 %v5292_v59  ;;  %v6873_v59 = vsub.f32 %v6835_v6, %v3794_v12  ;;  %v3905_v3 = vsub.f32 %v6868_v63, %v3904_v24 }
 0x46e   :  { %5297 = vmatprep.subr.bf16.mxu1 %v5296_v17  ;;  %v5388_v4 = vpack.c.bf16 %v3899_v16, %v3892_v62 }
 0x46f   :  { %v3911_v32 = vand.u32 4294901760, %v6873_v59  ;;  %v5412_v7 = vpack.c.bf16 %v6873_v59, %v6868_v63  ;;  %v4413_v63 = vld [vmem:[%s7077_s10] ss:$0 sm:$0xff] }
 0x471   :  { %5299 = vmatpush3.bf16.msra.mxu1 %v5296_v17  ;;  %v3797_v17 = vand.u32 4294901760, %v6853_v58  ;;  %v6898_v47 = vpack.c.bf16 %v3911_v32, %v3904_v24 }
 0x472   :  { %5301 = vmatprep.subr.bf16.mxu1 %v5300_v11 }
 0x473   :  { %v6892_v21 = vsub.f32 %v6853_v58, %v3797_v17  ;;  %v3933_v58 = vsub.f32 %v6906_v2, %v3932_v9 }
 0x475   :  { %5303 = vmatpush3.bf16.msra.mxu1 %v5300_v11  ;;  %v3800_v11 = vand.u32 4294901760, %v6855_v57  ;;  %v3918_v8 = vand.u32 4294901760, %v6892_v21  ;;  %v3934_v5 = vand.u32 4294901760, %v3933_v58 }
 0x476   :  { %5305 = vmatprep.subr.bf16.mxu1 %v6716_v31 }
 0x477   :  { %v6895_v28 = vsub.f32 %v6855_v57, %v3800_v11  ;;  %v3919_v6 = vsub.f32 %v6892_v21, %v3918_v8  ;;  %v3940_v57 = vsub.f32 %v6908_v51, %v3939_v1 }
 0x478   :  { %4711 = vmatmul.mubr.f32.vlgmr.msra.gmra.mrb[8].mxu1 %v6792_v48 }
 0x479   :  { %5307 = vmatpush3.bf16.msra.mxu1 %v6716_v31  ;;  %4733 = vmatprep.mubr.f32.mxu1 %v6782_v26  ;;  %v3925_v30 = vand.u32 4294901760, %v6895_v28  ;;  %v5416_v20 = vpack.c.bf16 %v6895_v28, %v6892_v21 }
 0x47a   :  { %5309 = vmatprep.subr.bf16.mxu1 %v6724_v44 }
 0x47b   :  { %v6916_v19 = vpack.c.bf16 %v3925_v30, %v3918_v8 }
 0x47d   :  { %5311 = vmatpush3.bf16.msra.mxu1 %v6724_v44 }
 0x47e   :  { %5313 = vmatprep.subr.bf16.mxu1 %v6752_v43 }
 0x481   :  { %5315 = vmatpush3.bf16.msra.mxu1 %v6752_v43 }
 0x482   :  { %5317 = vmatprep.subr.bf16.mxu1 %v6758_v13 }
 0x485   :  { %5319 = vmatpush3.bf16.msra.mxu1 %v6758_v13 }
 0x486   :  { %5321 = vmatprep.subr.bf16.mxu1 %v6760_v52 }
 0x489   :  { %5323 = vmatpush3.bf16.msra.mxu1 %v6760_v52 }
 0x48a   :  { %5325 = vmatprep.subr.bf16.mxu1 %v5324_v18 }
 0x48c   :  { %4734 = vmatmul.mubr.f32.vlgmr.msra.gmra.mrb[8].mxu1 %v6797_v46 }
 0x48d   :  { %5327 = vmatpush3.bf16.msra.mxu1 %v5324_v18  ;;  %4756 = vmatprep.mubr.f32.mxu1 %v6775_v22  ;;  %v5408_v18 = vpack.c.bf16 %v6845_v50, %v6840_v34 }
 0x48e   :  { %5329 = vmatprep.subr.bf16.mxu1 %v5328_v37 }
 0x491   :  { %5331 = vmatpush3.bf16.msra.mxu1 %v5328_v37 }
 0x492   :  { %5333 = vmatprep.subr.bf16.mxu1 %v6769_v61 }
 0x495   :  { %5335 = vmatpush3.bf16.msra.mxu1 %v6769_v61  ;;  %v3884_v61 = vsub.f32 %v6827_v25, %v3883_v27 }
 0x496   :  { %5337 = vmatprep.subr.bf16.mxu1 %v6771_v53 }
 0x499   :  { %5339 = vmatpush3.bf16.msra.mxu1 %v6771_v53  ;;  %v6978_v53 = vpack.c.bf16 %v3806_v41, %v3803_v40 }
 0x49a   :  { %5341 = vmatprep.subr.bf16.mxu1 %v6773_v0 }
 0x49d   :  { %5343 = vmatpush3.bf16.msra.mxu1 %v6773_v0 }
 0x49e   :  { %5345 = vmatprep.subr.bf16.mxu1 %v6716_v31 }
 0x4a0   :  { %4757 = vmatmul.mubr.f32.vlgmr.msra.gmra.mrb[8].mxu1 %v6789_v14 }
 0x4a1   :  { %5347 = vmatpush3.bf16.msra.mxu1 %v6716_v31  ;;  %4779 = vmatprep.mubr.f32.mxu1 %v6775_v22  ;;  %v6947_v31 = vpack.c.bf16 %v3782_v49, %v3779_v38  ;;  %v3912_v38 = vsub.f32 %v6873_v59, %v3911_v32 }
 0x4a2   :  { %5349 = vmatprep.subr.bf16.mxu1 %v6724_v44 }
 0x4a5   :  { %5351 = vmatpush3.bf16.msra.mxu1 %v6724_v44  ;;  %v6955_v44 = vpack.c.bf16 %v3788_v60, %v3785_v39  ;;  %v3906_v39 = vand.u32 4294901760, %v3905_v3  ;;  %v3913_v60 = vand.u32 4294901760, %v3912_v38 }
 0x4a6   :  { %5353 = vmatprep.subr.bf16.mxu1 %v6752_v43 }
 0x4a7   :  { %v5392_v27 = vpack.c.bf16 %v3913_v60, %v3906_v39 }
 0x4a9   :  { %5355 = vmatpush3.bf16.msra.mxu1 %v6752_v43  ;;  %v6965_v43 = vpack.c.bf16 %v3794_v12, %v3791_v35  ;;  %v3920_v35 = vand.u32 4294901760, %v3919_v6 }
 0x4aa   :  { %5357 = vmatprep.subr.bf16.mxu1 %v6758_v13 }
 0x4ad   :  { %5359 = vmatpush3.bf16.msra.mxu1 %v6758_v13  ;;  %v6969_v13 = vpack.c.bf16 %v3800_v11, %v3797_v17  ;;  %v5404_v11 = vpack.c.bf16 %v6827_v25, %v6822_v23 }
 0x4ae   :  { %5361 = vmatprep.subr.bf16.mxu1 %v6760_v52 }
 0x4b1   :  { %5363 = vmatpush3.bf16.msra.mxu1 %v6760_v52  ;;  %v3877_v52 = vsub.f32 %v6822_v23, %v3876_v54  ;;  %v3926_v54 = vsub.f32 %v6895_v28, %v3925_v30  ;;  %v5420_v23 = vpack.c.bf16 %v6908_v51, %v6906_v2 }
 0x4b2   :  { %5365 = vmatprep.subr.bf16.mxu1 %v6947_v31 }
 0x4b3   :  { %v3878_v0 = vand.u32 4294901760, %v3877_v52  ;;  %v3927_v12 = vand.u32 4294901760, %v3926_v54 }
 0x4b4   :  { %4780 = vmatmul.mubr.f32.vlgmr.msra.gmra.mrb[8].mxu1 %v6789_v14 }
 0x4b5   :  { %5367 = vmatpush3.bf16.msra.mxu1 %v6947_v31  ;;  %4802 = vmatprep.mubr.f32.mxu1 %v6786_v29  ;;  %v3885_v29 = vand.u32 4294901760, %v3884_v61  ;;  %v5396_v45 = vpack.c.bf16 %v3927_v12, %v3920_v35 }
 0x4b6   :  { %5369 = vmatprep.subr.bf16.mxu1 %v6955_v44 }
 0x4b7   :  { %v5384_v49 = vpack.c.bf16 %v3885_v29, %v3878_v0 }
 0x4b9   :  { %5371 = vmatpush3.bf16.msra.mxu1 %v6955_v44 }
 0x4ba   :  { %5373 = vmatprep.subr.bf16.mxu1 %v6965_v43 }
 0x4bd   :  { %5375 = vmatpush3.bf16.msra.mxu1 %v6965_v43 }
 0x4be   :  { %5377 = vmatprep.subr.bf16.mxu1 %v6969_v13 }
 0x4c1   :  { %5379 = vmatpush3.bf16.msra.mxu1 %v6969_v13 }
 0x4c2   :  { %5381 = vmatprep.subr.bf16.mxu1 %v6978_v53 }
 0x4c5   :  { %5383 = vmatpush3.bf16.msra.mxu1 %v6978_v53 }
 0x4c6   :  { %5385 = vmatprep.subr.bf16.mxu1 %v5384_v49 }
 0x4c8   :  { %4803 = vmatmul.mubr.f32.vlgmr.msra.gmra.mrb[10].mxu1 %v6801_v33  ;;  %v3941_v33 = vand.u32 4294901760, %v3940_v57 }
 0x4c9   :  { %5387 = vmatpush3.bf16.msra.mxu1 %v5384_v49  ;;  %4825 = vmatprep.mubr.f32.mxu1 %v6775_v22 }
 0x4ca   :  { %5389 = vmatprep.subr.bf16.mxu1 %v5388_v4  ;;  %v5400_v17 = vpack.c.bf16 %v3941_v33, %v3934_v5 }
 0x4cd   :  { %5391 = vmatpush3.bf16.msra.mxu1 %v5388_v4 }
 0x4ce   :  { %5393 = vmatprep.subr.bf16.mxu1 %v5392_v27 }
 0x4d1   :  { %5395 = vmatpush3.bf16.msra.mxu1 %v5392_v27 }
 0x4d2   :  { %5397 = vmatprep.subr.bf16.mxu1 %v5396_v45 }
 0x4d5   :  { %5399 = vmatpush3.bf16.msra.mxu1 %v5396_v45 }
 0x4d6   :  { %5401 = vmatprep.subr.bf16.mxu1 %v5400_v17 }
 0x4d9   :  { %5403 = vmatpush3.bf16.msra.mxu1 %v5400_v17 }
 0x4da   :  { %5405 = vmatprep.subr.bf16.mxu1 %v5404_v11 }
 0x4dc   :  { %4826 = vmatmul.mubr.f32.vlgmr.msra.gmra.mrb[10].mxu1 %v6789_v14 }
 0x4dd   :  { %5407 = vmatpush3.bf16.msra.mxu1 %v5404_v11  ;;  %4848 = vmatprep.mubr.f32.mxu1 %v6779_v36 }
 0x4de   :  { %5409 = vmatprep.subr.bf16.mxu1 %v5408_v18 }
 0x4e1   :  { %5411 = vmatpush3.bf16.msra.mxu1 %v5408_v18 }
 0x4e2   :  { %5413 = vmatprep.subr.bf16.mxu1 %v5412_v7 }
 0x4e5   :  { %5415 = vmatpush3.bf16.msra.mxu1 %v5412_v7 }
 0x4e6   :  { %5417 = vmatprep.subr.bf16.mxu1 %v5416_v20 }
 0x4e9   :  { %5419 = vmatpush3.bf16.msra.mxu1 %v5416_v20 }
 0x4ea   :  { %5421 = vmatprep.subr.bf16.mxu1 %v5420_v23 }
 0x4ed   :  { %5423 = vmatpush3.bf16.msra.mxu1 %v5420_v23 }
 0x4ee   :  { %5425 = vmatprep.subr.bf16.mxu1 %v6947_v31 }
 0x4f0   :  { %4849 = vmatmul.mubr.f32.vlgmr.msra.gmra.mrb[10].mxu1 %v6792_v48 }
 0x4f1   :  { %5427 = vmatpush3.bf16.msra.mxu1 %v6947_v31  ;;  %4871 = vmatprep.mubr.f32.mxu1 %v6782_v26  ;;  %v4412_v26 = vld [vmem:[%s7075_s8] ss:$0 sm:$0xff] }
 0x4f2   :  { %5429 = vmatprep.subr.bf16.mxu1 %v6955_v44 }
 0x4f5   :  { %5431 = vmatpush3.bf16.msra.mxu1 %v6955_v44 }
 0x4f6   :  { %5433 = vmatprep.subr.bf16.mxu1 %v6965_v43 }
 0x4f9   :  { %5435 = vmatpush3.bf16.msra.mxu1 %v6965_v43 }
 0x4fa   :  { %5437 = vmatprep.subr.bf16.mxu1 %v6969_v13 }
 0x4fd   :  { %5439 = vmatpush3.bf16.msra.mxu1 %v6969_v13 }
 0x4fe   :  { %5441 = vmatprep.subr.bf16.mxu1 %v6978_v53 }
 0x501   :  { %5443 = vmatpush3.bf16.msra.mxu1 %v6978_v53 }
 0x502   :  { %5445 = vmatprep.subr.bf16.mxu1 %v6861_v56 }
 0x504   :  { %4872 = vmatmul.mubr.f32.vlgmr.msra.gmra.mrb[10].mxu1 %v6797_v46 }
 0x505   :  { %5447 = vmatpush3.bf16.msra.mxu1 %v6861_v56  ;;  %4894 = vmatprep.mubr.f32.mxu1 %v6775_v22 }
 0x506   :  { %5449 = vmatprep.subr.bf16.mxu1 %v6882_v15 }
 0x509   :  { %5451 = vmatpush3.bf16.msra.mxu1 %v6882_v15 }
 0x50a   :  { %5453 = vmatprep.subr.bf16.mxu1 %v6898_v47 }
 0x50d   :  { %5455 = vmatpush3.bf16.msra.mxu1 %v6898_v47 }
 0x50e   :  { %5457 = vmatprep.subr.bf16.mxu1 %v6916_v19 }
 0x511   :  { %5459 = vmatpush3.bf16.msra.mxu1 %v6916_v19 }
 0x512   :  { %5461 = vmatprep.subr.bf16.mxu1 %v6924_v42 }
 0x515   :  { %5463 = vmatpush3.bf16.msra.mxu1 %v6924_v42 }
 0x516   :  { %5465 = vmatprep.subr.bf16.mxu1 %v6947_v31 }
 0x518   :  { %4895 = vmatmul.mubr.f32.vlgmr.msra.gmra.mrb[10].mxu1 %v6789_v14 }
 0x519   :  { %5467 = vmatpush3.bf16.msra.mxu1 %v6947_v31  ;;  %4917 = vmatprep.mubr.f32.mxu1 %v6775_v22 }
 0x51a   :  { %5469 = vmatprep.subr.bf16.mxu1 %v6955_v44 }
 0x51d   :  { %5471 = vmatpush3.bf16.msra.mxu1 %v6955_v44 }
 0x51e   :  { %5473 = vmatprep.subr.bf16.mxu1 %v6965_v43 }
 0x521   :  { %5475 = vmatpush3.bf16.msra.mxu1 %v6965_v43 }
 0x522   :  { %5477 = vmatprep.subr.bf16.mxu1 %v6969_v13 }
 0x525   :  { %5479 = vmatpush3.bf16.msra.mxu1 %v6969_v13 }
 0x526   :  { %5481 = vmatprep.subr.bf16.mxu1 %v6978_v53 }
 0x529   :  { %5483 = vmatpush3.bf16.msra.mxu1 %v6978_v53 }
 0x52c   :  { %4918 = vmatmul.mubr.f32.vlgmr.msra.gmra.mrb[10].mxu1 %v6789_v14 }
 0x53f   :  { %v4666_v36 = vpop.f32.mrb[10].mxu0 }
 0x540   :  { %v3236_v22 = vpop.f32.mrb[11].mxu0  ;;  %v3247_v48 = vadd.f32 %v4666_v36, %v4412_v26 }
 0x541   :  { %v3237_v46 = vadd.f32 %v4412_v26, %v3236_v22 }
 0x587   :  { %v4781_v25 = vpop.f32.mrb[8].mxu1 }
 0x588   :  { %v5494_v34 = vadd.f32 %v4781_v25, %v3247_v48  ;;  %v3751_v50 = vpop.f32.mrb[9].mxu1 }
 0x589   :  { %v5496_v56 = vadd.f32 %v3751_v50, %v3237_v46 }
 0x5ff   :  { %v4919_v59 = vpop.f32.mrb[10].mxu1 }
 0x600   :  { %v5497_v15 = vadd.f32 %v4919_v59, %v4413_v63  ;;  %v4374_v24 = vpop.f32.mrb[11].mxu1 }
 0x601   :  { %v5498_v14 = vadd.f32 %v4413_v63, %v4374_v24 }
 0x602   :  { %v4415_v32 = vmul.f32 -1.442695, %v5497_v15 }
 0x603   :  { %v4414_v21 = vmul.f32 -1.442695, %v5498_v14 }
 0x604   :  { %5630 = vpow2.f32 %v4415_v32 }
 0x605   :  { %5632 = vpow2.f32 %v4414_v21 }
 0x60e   :  { %v5631_v28 = vpop.eup %5630 }
 0x60f   :  { %v5633_v40 = vpop.eup %5632  ;;  %v4391_v41 = vadd.f32 1.0, %v5631_v28 }
 0x610   :  { %v4390_v47 = vadd.f32 1.0, %v5633_v40 }
 0x611   :  { %5634 = vrcp.f32 %v4391_v41 }
 0x612   :  { %5636 = vrcp.f32 %v4390_v47 }
 0x61b   :  { %v5635_v37 = vpop.eup %5634 }
 0x61c   :  { %v5637_v8 = vpop.eup %5636  ;;  %v4397_v30 = vmul.f32 %v5635_v37, %v5494_v34 }
 0x61d   :  { %v4396_v2 = vmul.f32 %v5637_v8, %v5496_v56 }
 0x61e   :  { %5638 = vtanh.f32 %v4397_v30 }
 0x61f   :  { %5640 = vtanh.f32 %v4396_v2 }
 0x628   :  { %v5639_v51 = vpop.eup %5638 }
 0x629   :  { %v5641_v19 = vpop.eup %5640  ;;  %4401 = vst [vmem:[%s7078_s11 + $0x8] sm:$0xff] %v5639_v51 }
 0x62a   :  { %4400 = vst [vmem:[%s7078_s11] sm:$0xff] %v5641_v19 }
 0x62b   :  { %4406 = vsyncpa [#allocation3], 1 }
 0x62c   :  { %4407 = vsyncpa [#allocation5], 1 }

</bundles_post_ra>
